<compile_context>
chip_gen: v5e
topology: v5e:2x2
jax: 0.10.0
libtpu: 0.0.40
codegen_flags: <defaults>
</compile_context>

<pallas_src>
import functools

import jax
import jax.numpy as jnp
from jax import lax
from jax.experimental import pallas as pl
from jax.experimental.pallas import tpu as pltpu

K0, P0 = 5, 2            # conv0: depthwise 5x5, padding 2
K1, D1, P1 = 7, 3, 9     # conv_spatial: depthwise 7x7, dilation 3, padding 9


def low_mixer_kernel(x_ref, w0_ref, w1_ref, w2_ref, b_ref, o_ref,
                     pad0_ref, pad1_ref, *, C):
    H, L = x_ref.shape                              # lane dim = N*W*C (lane dense)

    xf = x_ref[...].astype(jnp.float32)             # (H, L)  -- this is `u`
    w0 = w0_ref[...]                                # (K0*K0, 1, L) masked + counter-rolled
    w1 = w1_ref[...]                                # (K1*K1, 1, L)
    b0 = b_ref[0:1, :]                              # (1, L)
    b1 = b_ref[1:2, :]
    b2 = b_ref[2:3, :]

    # ---- H-halo scratch: zero only the border rows; interiors are written
    #      exactly once with real data (no W halo -> no narrow masked stores).
    pad0_ref[0:P0, :] = jnp.zeros((P0, L), jnp.float32)
    pad0_ref[P0 + H:P0 + H + P0, :] = jnp.zeros((P0, L), jnp.float32)
    pad0_ref[P0:P0 + H, :] = xf

    pad1_ref[0:P1, :] = jnp.zeros((P1, L), jnp.float32)
    pad1_ref[P1 + H:P1 + H + P1, :] = jnp.zeros((P1, L), jnp.float32)

    def depthwise(pad_ref, w, bias, K, dil, center):
        # out[h, l] = bias + sum_j roll( sum_i pad[dil*i + h, :] * w[i, j], k_j )
        # The wrapper counter-rolled w[i, j] along lanes, so the single roll
        # per j reproduces the (boundary-masked) tap exactly: only K rolls.
        partial = [None] * K
        for i in range(K):
            row = pad_ref[dil * i:dil * i + H, :]    # one sublane-window load per i
            for j in range(K):
                contrib = row * w[i * K + j]
                partial[j] = contrib if partial[j] is None else partial[j] + contrib
        acc = jnp.broadcast_to(bias, (H, L))
        for j in range(K):
            shift = (-(dil * (j - center)) * C) % L  # static python int
            v = partial[j] if shift == 0 else pltpu.roll(partial[j], shift=shift, axis=1)
            acc = acc + v
        return acc

    # ---- conv0: depthwise 5x5, padding 2 ------------------------------------
    acc0 = depthwise(pad0_ref, w0, b0, K0, 1, P0)

    # ---- conv_spatial: depthwise 7x7, dilation 3, padding 9 ------------------
    pad1_ref[P1:P1 + H, :] = acc0
    acc1 = depthwise(pad1_ref, w1, b1, K1, D1, 3)

    # ---- conv1: 1x1 pointwise conv as one bf16 MXU matmul, f32 accumulation --
    attn = jnp.dot(acc1.astype(jnp.bfloat16), w2_ref[...],
                   preferred_element_type=jnp.float32) + b2

    # ---- gate: u * attn -------------------------------------------------------
    o_ref[...] = (xf * attn).astype(o_ref.dtype)


def _expand_dw_weights(w_kkc, K, dil, center, N, W, C):
    """Tile depthwise weights onto the (n, w, c) lane layout, zero taps that
    would read across a W boundary / image seam, and counter-roll each tap
    along lanes so the kernel only needs one pltpu.roll per kernel column."""
    L = N * W * C
    wpos = jnp.arange(W)
    rows = []
    for i in range(K):
        for j in range(K):
            s = dil * (j - center)                  # W offset of this tap
            valid = ((wpos + s >= 0) & (wpos + s < W)).astype(jnp.float32)   # (W,)
            lane = (valid[:, None] * w_kkc[i, j][None, :]).reshape(W * C)
            lane = jnp.tile(lane, N)                # (L,)
            lane = jnp.roll(lane, s * C)            # counter-roll (see kernel)
            rows.append(lane)
    return jnp.stack(rows).reshape(K * K, 1, L).astype(jnp.float32)


def low_mixer(x_nhwc, w0, b0, w1, b1, w2t, b2):
    """x_nhwc: (N,H,W,C); w0:(K0,K0,C); w1:(K1,K1,C); w2t:(C_in,C_out); biases:(C,)."""
    N, H, W, C = x_nhwc.shape
    L = N * W * C
    f32 = jnp.float32

    # Pack (batch, W, C) onto the lane dimension: (N,H,W,C) -> (H, N*W*C).
    x2 = jnp.transpose(x_nhwc, (1, 0, 2, 3)).reshape(H, L)

    # Parameters expanded once in the wrapper (masked + counter-rolled taps).
    w0r = _expand_dw_weights(w0.astype(f32), K0, 1, P0, N, W, C)
    w1r = _expand_dw_weights(w1.astype(f32), K1, D1, 3, N, W, C)
    b_all = jnp.stack([jnp.tile(b0.astype(f32), N * W),
                       jnp.tile(b1.astype(f32), N * W),
                       jnp.tile(b2.astype(f32), N * W)])          # (3, L)
    # Block-diagonal expansion of the 1x1 conv -> single (H,L)x(L,L) MXU dot,
    # bf16 operands (MXU-native), f32 accumulation in the kernel.
    w2big = jnp.kron(jnp.eye(N * W, dtype=f32),
                     w2t.astype(f32)).astype(jnp.bfloat16)        # (L, L)
    # TODO(synk): for C >= 128 use C-on-lanes NHWC + (H*W,C)x(C,C) dot and tile
    # H as a "parallel" grid axis (v7x megacore / 64 MiB VMEM) instead.

    kernel = functools.partial(low_mixer_kernel, C=C)
    out2 = pl.pallas_call(
        kernel,
        out_shape=jax.ShapeDtypeStruct((H, L), x_nhwc.dtype),
        grid_spec=pltpu.PrefetchScalarGridSpec(
            num_scalar_prefetch=0,
            grid=(1,),                               # whole batch in one step
            in_specs=[
                pl.BlockSpec((H, L), lambda n: (0, 0)),
                pl.BlockSpec((K0 * K0, 1, L), lambda n: (0, 0, 0)),
                pl.BlockSpec((K1 * K1, 1, L), lambda n: (0, 0, 0)),
                pl.BlockSpec((L, L), lambda n: (0, 0)),
                pl.BlockSpec((3, L), lambda n: (0, 0)),
            ],
            out_specs=pl.BlockSpec((H, L), lambda n: (0, 0)),
            scratch_shapes=[
                pltpu.VMEM((H + 2 * P0, L), jnp.float32),
                pltpu.VMEM((H + 2 * P1, L), jnp.float32),
            ],
        ),
        compiler_params=pltpu.CompilerParams(
            dimension_semantics=("arbitrary",)),
    )(x2, w0r, w1r, w2big, b_all)
    return jnp.transpose(out2.reshape(H, N, W, C), (1, 0, 2, 3))


def ref_low_mixer(x_nhwc, w0, b0, w1, b1, w2t, b2):
    """Pure-JAX reference (matches the PyTorch forward, NHWC), f32-exact."""
    dn = ('NHWC', 'HWIO', 'NHWC')
    C = x_nhwc.shape[-1]
    hi = lax.Precision.HIGHEST
    k0 = w0.reshape(K0, K0, 1, C)
    a = lax.conv_general_dilated(x_nhwc, k0, (1, 1), ((P0, P0), (P0, P0)),
                                 dimension_numbers=dn, feature_group_count=C,
                                 precision=hi) + b0.reshape(1, 1, 1, C)
    k1 = w1.reshape(K1, K1, 1, C)
    a = lax.conv_general_dilated(a, k1, (1, 1), ((P1, P1), (P1, P1)),
                                 rhs_dilation=(D1, D1), dimension_numbers=dn,
                                 feature_group_count=C,
                                 precision=hi) + b1.reshape(1, 1, 1, C)
    a = jnp.einsum('nhwc,cd->nhwd', a, w2t, precision=hi) + b2.reshape(1, 1, 1, C)
    return x_nhwc * a


if __name__ == "__main__":
    N, C, H, W = 2, 4, 16, 16
    key = jax.random.PRNGKey(0)
    ks = jax.random.split(key, 7)

    # deterministic "checkpoint-free" parameters
    x_nchw = jax.random.normal(ks[0], (N, C, H, W), jnp.float32)
    w0 = jax.random.normal(ks[1], (K0, K0, C), jnp.float32) * 0.1   # depthwise 5x5
    b0 = jax.random.normal(ks[2], (C,), jnp.float32) * 0.1
    w1 = jax.random.normal(ks[3], (K1, K1, C), jnp.float32) * 0.1   # depthwise 7x7 (dil=3)
    b1 = jax.random.normal(ks[4], (C,), jnp.float32) * 0.1
    w2t = jax.random.normal(ks[5], (C, C), jnp.float32) * 0.1       # 1x1 conv, (C_in, C_out)
    b2 = jax.random.normal(ks[6], (C,), jnp.float32) * 0.1

    x_nhwc = jnp.transpose(x_nchw, (0, 2, 3, 1))   # NCHW -> NHWC for the kernel

    out = low_mixer(x_nhwc, w0, b0, w1, b1, w2t, b2)
    out = jax.block_until_ready(out)

    ref = ref_low_mixer(x_nhwc, w0, b0, w1, b1, w2t, b2)
    err = float(jnp.max(jnp.abs(out - ref)))
    # Tolerance covers the bf16 MXU pass on the 1x1 matmul (typical err ~1e-3);
    # any structural bug (wrong tap offset / mask / roll direction) gives O(0.1+).
    assert err < 2e-2, f"mismatch vs reference: {err}"

    _ = jnp.transpose(out, (0, 3, 1, 2))           # back to NCHW (PyTorch convention)
    print("KERNEL_OK")
</pallas_src>

<mosaic_0001>
module attributes {stable_mosaic.version = 11 : i64} {
  func.func @low_mixer_kernel(%arg0: i32, %arg1: memref<16x128xf32, #tpu.memory_space<vmem>>, %arg2: memref<25x1x128xf32, #tpu.memory_space<vmem>>, %arg3: memref<49x1x128xf32, #tpu.memory_space<vmem>>, %arg4: memref<128x128xbf16, #tpu.memory_space<vmem>>, %arg5: memref<3x128xf32, #tpu.memory_space<vmem>>, %arg6: memref<16x128xf32, #tpu.memory_space<vmem>>, %arg7: memref<20x128xf32, #tpu.memory_space<vmem>>, %arg8: memref<34x128xf32, #tpu.memory_space<vmem>>) attributes {dimension_semantics = [#tpu.dimension_semantics<arbitrary>], iteration_bounds = array<i64: 1>, scalar_prefetch = 0 : i64, scratch_operands = 2 : i64, tpu.core_type = #tpu.core_type<tc>, window_params = [{pipeline_mode = #tpu.pipeline_mode<synchronous>, transform_indices = @transform_0, window_bounds = array<i64: 16, 128>}, {pipeline_mode = #tpu.pipeline_mode<synchronous>, transform_indices = @transform_1, window_bounds = array<i64: 25, 1, 128>}, {pipeline_mode = #tpu.pipeline_mode<synchronous>, transform_indices = @transform_2, window_bounds = array<i64: 49, 1, 128>}, {pipeline_mode = #tpu.pipeline_mode<synchronous>, transform_indices = @transform_3, window_bounds = array<i64: 128, 128>}, {pipeline_mode = #tpu.pipeline_mode<synchronous>, transform_indices = @transform_4, window_bounds = array<i64: 3, 128>}, {pipeline_mode = #tpu.pipeline_mode<synchronous>, transform_indices = @transform_5, window_bounds = array<i64: 16, 128>}]} {
    %c0 = arith.constant 0 : index
    %c0_0 = arith.constant 0 : index
    %0 = vector.load %arg1[%c0, %c0_0] : memref<16x128xf32, #tpu.memory_space<vmem>>, vector<16x128xf32>
    %c0_1 = arith.constant 0 : index
    %c0_2 = arith.constant 0 : index
    %c0_3 = arith.constant 0 : index
    %1 = vector.load %arg2[%c0_1, %c0_2, %c0_3] : memref<25x1x128xf32, #tpu.memory_space<vmem>>, vector<25x1x128xf32>
    %c0_4 = arith.constant 0 : index
    %c0_5 = arith.constant 0 : index
    %c0_6 = arith.constant 0 : index
    %2 = vector.load %arg3[%c0_4, %c0_5, %c0_6] : memref<49x1x128xf32, #tpu.memory_space<vmem>>, vector<49x1x128xf32>
    %c0_7 = arith.constant 0 : index
    %c0_8 = arith.constant 0 : index
    %3 = vector.load %arg5[%c0_7, %c0_8] : memref<3x128xf32, #tpu.memory_space<vmem>>, vector<1x128xf32>
    %c1 = arith.constant 1 : index
    %c0_9 = arith.constant 0 : index
    %4 = vector.load %arg5[%c1, %c0_9] : memref<3x128xf32, #tpu.memory_space<vmem>>, vector<1x128xf32>
    %c2 = arith.constant 2 : index
    %c0_10 = arith.constant 0 : index
    %5 = vector.load %arg5[%c2, %c0_10] : memref<3x128xf32, #tpu.memory_space<vmem>>, vector<1x128xf32>
    %cst = arith.constant 0.000000e+00 : f32
    %6 = vector.broadcast %cst : f32 to vector<2x128xf32>
    %c0_11 = arith.constant 0 : index
    %c0_12 = arith.constant 0 : index
    %7 = vector.load %arg7[%c0_11, %c0_12] : memref<20x128xf32, #tpu.memory_space<vmem>>, vector<2x128xf32>
    tpu.vector_store %arg7[%c0_11, %c0_12], %6 {strides = array<i32>} : memref<20x128xf32, #tpu.memory_space<vmem>>, vector<2x128xf32>,
    %cst_13 = arith.constant 0.000000e+00 : f32
    %8 = vector.broadcast %cst_13 : f32 to vector<2x128xf32>
    %c18 = arith.constant 18 : index
    %c0_14 = arith.constant 0 : index
    %9 = vector.load %arg7[%c18, %c0_14] : memref<20x128xf32, #tpu.memory_space<vmem>>, vector<2x128xf32>
    tpu.vector_store %arg7[%c18, %c0_14], %8 {strides = array<i32>} : memref<20x128xf32, #tpu.memory_space<vmem>>, vector<2x128xf32>,
    %c2_15 = arith.constant 2 : index
    %c0_16 = arith.constant 0 : index
    %10 = vector.load %arg7[%c2_15, %c0_16] : memref<20x128xf32, #tpu.memory_space<vmem>>, vector<16x128xf32>
    tpu.vector_store %arg7[%c2_15, %c0_16], %0 {strides = array<i32>} : memref<20x128xf32, #tpu.memory_space<vmem>>, vector<16x128xf32>,
    %cst_17 = arith.constant 0.000000e+00 : f32
    %11 = vector.broadcast %cst_17 : f32 to vector<9x128xf32>
    %c0_18 = arith.constant 0 : index
    %c0_19 = arith.constant 0 : index
    %12 = vector.load %arg8[%c0_18, %c0_19] : memref<34x128xf32, #tpu.memory_space<vmem>>, vector<9x128xf32>
    tpu.vector_store %arg8[%c0_18, %c0_19], %11 {strides = array<i32>} : memref<34x128xf32, #tpu.memory_space<vmem>>, vector<9x128xf32>,
    %cst_20 = arith.constant 0.000000e+00 : f32
    %13 = vector.broadcast %cst_20 : f32 to vector<9x128xf32>
    %c25 = arith.constant 25 : index
    %c0_21 = arith.constant 0 : index
    %14 = vector.load %arg8[%c25, %c0_21] : memref<34x128xf32, #tpu.memory_space<vmem>>, vector<9x128xf32>
    tpu.vector_store %arg8[%c25, %c0_21], %13 {strides = array<i32>} : memref<34x128xf32, #tpu.memory_space<vmem>>, vector<9x128xf32>,
    %c0_22 = arith.constant 0 : index
    %c0_23 = arith.constant 0 : index
    %15 = vector.load %arg7[%c0_22, %c0_23] : memref<20x128xf32, #tpu.memory_space<vmem>>, vector<16x128xf32>
    %16 = vector.extract_strided_slice %1 {offsets = [0, 0, 0], sizes = [1, 1, 128], strides = [1, 1, 1]} : vector<25x1x128xf32> to vector<1x1x128xf32>
    %17 = vector.shape_cast %16 : vector<1x1x128xf32> to vector<1x128xf32>
    %18 = vector.broadcast %17 : vector<1x128xf32> to vector<16x128xf32>
    %19 = arith.mulf %15, %18 : vector<16x128xf32>
    %20 = vector.extract_strided_slice %1 {offsets = [1, 0, 0], sizes = [1, 1, 128], strides = [1, 1, 1]} : vector<25x1x128xf32> to vector<1x1x128xf32>
    %21 = vector.shape_cast %20 : vector<1x1x128xf32> to vector<1x128xf32>
    %22 = vector.broadcast %21 : vector<1x128xf32> to vector<16x128xf32>
    %23 = arith.mulf %15, %22 : vector<16x128xf32>
    %24 = vector.extract_strided_slice %1 {offsets = [2, 0, 0], sizes = [1, 1, 128], strides = [1, 1, 1]} : vector<25x1x128xf32> to vector<1x1x128xf32>
    %25 = vector.shape_cast %24 : vector<1x1x128xf32> to vector<1x128xf32>
    %26 = vector.broadcast %25 : vector<1x128xf32> to vector<16x128xf32>
    %27 = arith.mulf %15, %26 : vector<16x128xf32>
    %28 = vector.extract_strided_slice %1 {offsets = [3, 0, 0], sizes = [1, 1, 128], strides = [1, 1, 1]} : vector<25x1x128xf32> to vector<1x1x128xf32>
    %29 = vector.shape_cast %28 : vector<1x1x128xf32> to vector<1x128xf32>
    %30 = vector.broadcast %29 : vector<1x128xf32> to vector<16x128xf32>
    %31 = arith.mulf %15, %30 : vector<16x128xf32>
    %32 = vector.extract_strided_slice %1 {offsets = [4, 0, 0], sizes = [1, 1, 128], strides = [1, 1, 1]} : vector<25x1x128xf32> to vector<1x1x128xf32>
    %33 = vector.shape_cast %32 : vector<1x1x128xf32> to vector<1x128xf32>
    %34 = vector.broadcast %33 : vector<1x128xf32> to vector<16x128xf32>
    %35 = arith.mulf %15, %34 : vector<16x128xf32>
    %c1_24 = arith.constant 1 : index
    %c0_25 = arith.constant 0 : index
    %36 = vector.load %arg7[%c1_24, %c0_25] : memref<20x128xf32, #tpu.memory_space<vmem>>, vector<16x128xf32>
    %37 = vector.extract_strided_slice %1 {offsets = [5, 0, 0], sizes = [1, 1, 128], strides = [1, 1, 1]} : vector<25x1x128xf32> to vector<1x1x128xf32>
    %38 = vector.shape_cast %37 : vector<1x1x128xf32> to vector<1x128xf32>
    %39 = vector.broadcast %38 : vector<1x128xf32> to vector<16x128xf32>
    %40 = arith.mulf %36, %39 : vector<16x128xf32>
    %41 = arith.addf %19, %40 : vector<16x128xf32>
    %42 = vector.extract_strided_slice %1 {offsets = [6, 0, 0], sizes = [1, 1, 128], strides = [1, 1, 1]} : vector<25x1x128xf32> to vector<1x1x128xf32>
    %43 = vector.shape_cast %42 : vector<1x1x128xf32> to vector<1x128xf32>
    %44 = vector.broadcast %43 : vector<1x128xf32> to vector<16x128xf32>
    %45 = arith.mulf %36, %44 : vector<16x128xf32>
    %46 = arith.addf %23, %45 : vector<16x128xf32>
    %47 = vector.extract_strided_slice %1 {offsets = [7, 0, 0], sizes = [1, 1, 128], strides = [1, 1, 1]} : vector<25x1x128xf32> to vector<1x1x128xf32>
    %48 = vector.shape_cast %47 : vector<1x1x128xf32> to vector<1x128xf32>
    %49 = vector.broadcast %48 : vector<1x128xf32> to vector<16x128xf32>
    %50 = arith.mulf %36, %49 : vector<16x128xf32>
    %51 = arith.addf %27, %50 : vector<16x128xf32>
    %52 = vector.extract_strided_slice %1 {offsets = [8, 0, 0], sizes = [1, 1, 128], strides = [1, 1, 1]} : vector<25x1x128xf32> to vector<1x1x128xf32>
    %53 = vector.shape_cast %52 : vector<1x1x128xf32> to vector<1x128xf32>
    %54 = vector.broadcast %53 : vector<1x128xf32> to vector<16x128xf32>
    %55 = arith.mulf %36, %54 : vector<16x128xf32>
    %56 = arith.addf %31, %55 : vector<16x128xf32>
    %57 = vector.extract_strided_slice %1 {offsets = [9, 0, 0], sizes = [1, 1, 128], strides = [1, 1, 1]} : vector<25x1x128xf32> to vector<1x1x128xf32>
    %58 = vector.shape_cast %57 : vector<1x1x128xf32> to vector<1x128xf32>
    %59 = vector.broadcast %58 : vector<1x128xf32> to vector<16x128xf32>
    %60 = arith.mulf %36, %59 : vector<16x128xf32>
    %61 = arith.addf %35, %60 : vector<16x128xf32>
    %c2_26 = arith.constant 2 : index
    %c0_27 = arith.constant 0 : index
    %62 = vector.load %arg7[%c2_26, %c0_27] : memref<20x128xf32, #tpu.memory_space<vmem>>, vector<16x128xf32>
    %63 = vector.extract_strided_slice %1 {offsets = [10, 0, 0], sizes = [1, 1, 128], strides = [1, 1, 1]} : vector<25x1x128xf32> to vector<1x1x128xf32>
    %64 = vector.shape_cast %63 : vector<1x1x128xf32> to vector<1x128xf32>
    %65 = vector.broadcast %64 : vector<1x128xf32> to vector<16x128xf32>
    %66 = arith.mulf %62, %65 : vector<16x128xf32>
    %67 = arith.addf %41, %66 : vector<16x128xf32>
    %68 = vector.extract_strided_slice %1 {offsets = [11, 0, 0], sizes = [1, 1, 128], strides = [1, 1, 1]} : vector<25x1x128xf32> to vector<1x1x128xf32>
    %69 = vector.shape_cast %68 : vector<1x1x128xf32> to vector<1x128xf32>
    %70 = vector.broadcast %69 : vector<1x128xf32> to vector<16x128xf32>
    %71 = arith.mulf %62, %70 : vector<16x128xf32>
    %72 = arith.addf %46, %71 : vector<16x128xf32>
    %73 = vector.extract_strided_slice %1 {offsets = [12, 0, 0], sizes = [1, 1, 128], strides = [1, 1, 1]} : vector<25x1x128xf32> to vector<1x1x128xf32>
    %74 = vector.shape_cast %73 : vector<1x1x128xf32> to vector<1x128xf32>
    %75 = vector.broadcast %74 : vector<1x128xf32> to vector<16x128xf32>
    %76 = arith.mulf %62, %75 : vector<16x128xf32>
    %77 = arith.addf %51, %76 : vector<16x128xf32>
    %78 = vector.extract_strided_slice %1 {offsets = [13, 0, 0], sizes = [1, 1, 128], strides = [1, 1, 1]} : vector<25x1x128xf32> to vector<1x1x128xf32>
    %79 = vector.shape_cast %78 : vector<1x1x128xf32> to vector<1x128xf32>
    %80 = vector.broadcast %79 : vector<1x128xf32> to vector<16x128xf32>
    %81 = arith.mulf %62, %80 : vector<16x128xf32>
    %82 = arith.addf %56, %81 : vector<16x128xf32>
    %83 = vector.extract_strided_slice %1 {offsets = [14, 0, 0], sizes = [1, 1, 128], strides = [1, 1, 1]} : vector<25x1x128xf32> to vector<1x1x128xf32>
    %84 = vector.shape_cast %83 : vector<1x1x128xf32> to vector<1x128xf32>
    %85 = vector.broadcast %84 : vector<1x128xf32> to vector<16x128xf32>
    %86 = arith.mulf %62, %85 : vector<16x128xf32>
    %87 = arith.addf %61, %86 : vector<16x128xf32>
    %c3 = arith.constant 3 : index
    %c0_28 = arith.constant 0 : index
    %88 = vector.load %arg7[%c3, %c0_28] : memref<20x128xf32, #tpu.memory_space<vmem>>, vector<16x128xf32>
    %89 = vector.extract_strided_slice %1 {offsets = [15, 0, 0], sizes = [1, 1, 128], strides = [1, 1, 1]} : vector<25x1x128xf32> to vector<1x1x128xf32>
    %90 = vector.shape_cast %89 : vector<1x1x128xf32> to vector<1x128xf32>
    %91 = vector.broadcast %90 : vector<1x128xf32> to vector<16x128xf32>
    %92 = arith.mulf %88, %91 : vector<16x128xf32>
    %93 = arith.addf %67, %92 : vector<16x128xf32>
    %94 = vector.extract_strided_slice %1 {offsets = [16, 0, 0], sizes = [1, 1, 128], strides = [1, 1, 1]} : vector<25x1x128xf32> to vector<1x1x128xf32>
    %95 = vector.shape_cast %94 : vector<1x1x128xf32> to vector<1x128xf32>
    %96 = vector.broadcast %95 : vector<1x128xf32> to vector<16x128xf32>
    %97 = arith.mulf %88, %96 : vector<16x128xf32>
    %98 = arith.addf %72, %97 : vector<16x128xf32>
    %99 = vector.extract_strided_slice %1 {offsets = [17, 0, 0], sizes = [1, 1, 128], strides = [1, 1, 1]} : vector<25x1x128xf32> to vector<1x1x128xf32>
    %100 = vector.shape_cast %99 : vector<1x1x128xf32> to vector<1x128xf32>
    %101 = vector.broadcast %100 : vector<1x128xf32> to vector<16x128xf32>
    %102 = arith.mulf %88, %101 : vector<16x128xf32>
    %103 = arith.addf %77, %102 : vector<16x128xf32>
    %104 = vector.extract_strided_slice %1 {offsets = [18, 0, 0], sizes = [1, 1, 128], strides = [1, 1, 1]} : vector<25x1x128xf32> to vector<1x1x128xf32>
    %105 = vector.shape_cast %104 : vector<1x1x128xf32> to vector<1x128xf32>
    %106 = vector.broadcast %105 : vector<1x128xf32> to vector<16x128xf32>
    %107 = arith.mulf %88, %106 : vector<16x128xf32>
    %108 = arith.addf %82, %107 : vector<16x128xf32>
    %109 = vector.extract_strided_slice %1 {offsets = [19, 0, 0], sizes = [1, 1, 128], strides = [1, 1, 1]} : vector<25x1x128xf32> to vector<1x1x128xf32>
    %110 = vector.shape_cast %109 : vector<1x1x128xf32> to vector<1x128xf32>
    %111 = vector.broadcast %110 : vector<1x128xf32> to vector<16x128xf32>
    %112 = arith.mulf %88, %111 : vector<16x128xf32>
    %113 = arith.addf %87, %112 : vector<16x128xf32>
    %c4 = arith.constant 4 : index
    %c0_29 = arith.constant 0 : index
    %114 = vector.load %arg7[%c4, %c0_29] : memref<20x128xf32, #tpu.memory_space<vmem>>, vector<16x128xf32>
    %115 = vector.extract_strided_slice %1 {offsets = [20, 0, 0], sizes = [1, 1, 128], strides = [1, 1, 1]} : vector<25x1x128xf32> to vector<1x1x128xf32>
    %116 = vector.shape_cast %115 : vector<1x1x128xf32> to vector<1x128xf32>
    %117 = vector.broadcast %116 : vector<1x128xf32> to vector<16x128xf32>
    %118 = arith.mulf %114, %117 : vector<16x128xf32>
    %119 = arith.addf %93, %118 : vector<16x128xf32>
    %120 = vector.extract_strided_slice %1 {offsets = [21, 0, 0], sizes = [1, 1, 128], strides = [1, 1, 1]} : vector<25x1x128xf32> to vector<1x1x128xf32>
    %121 = vector.shape_cast %120 : vector<1x1x128xf32> to vector<1x128xf32>
    %122 = vector.broadcast %121 : vector<1x128xf32> to vector<16x128xf32>
    %123 = arith.mulf %114, %122 : vector<16x128xf32>
    %124 = arith.addf %98, %123 : vector<16x128xf32>
    %125 = vector.extract_strided_slice %1 {offsets = [22, 0, 0], sizes = [1, 1, 128], strides = [1, 1, 1]} : vector<25x1x128xf32> to vector<1x1x128xf32>
    %126 = vector.shape_cast %125 : vector<1x1x128xf32> to vector<1x128xf32>
    %127 = vector.broadcast %126 : vector<1x128xf32> to vector<16x128xf32>
    %128 = arith.mulf %114, %127 : vector<16x128xf32>
    %129 = arith.addf %103, %128 : vector<16x128xf32>
    %130 = vector.extract_strided_slice %1 {offsets = [23, 0, 0], sizes = [1, 1, 128], strides = [1, 1, 1]} : vector<25x1x128xf32> to vector<1x1x128xf32>
    %131 = vector.shape_cast %130 : vector<1x1x128xf32> to vector<1x128xf32>
    %132 = vector.broadcast %131 : vector<1x128xf32> to vector<16x128xf32>
    %133 = arith.mulf %114, %132 : vector<16x128xf32>
    %134 = arith.addf %108, %133 : vector<16x128xf32>
    %135 = vector.extract_strided_slice %1 {offsets = [24, 0, 0], sizes = [1, 1, 128], strides = [1, 1, 1]} : vector<25x1x128xf32> to vector<1x1x128xf32>
    %136 = vector.shape_cast %135 : vector<1x1x128xf32> to vector<1x128xf32>
    %137 = vector.broadcast %136 : vector<1x128xf32> to vector<16x128xf32>
    %138 = arith.mulf %114, %137 : vector<16x128xf32>
    %139 = arith.addf %113, %138 : vector<16x128xf32>
    %140 = vector.shape_cast %3 : vector<1x128xf32> to vector<1x128xf32>
    %141 = vector.broadcast %140 : vector<1x128xf32> to vector<16x128xf32>
    %c8_i32 = arith.constant 8 : i32
    %142 = tpu.dynamic_rotate %119 by %c8_i32 dim 1 : vector<16x128xf32>, i32 -> vector<16x128xf32>
    %143 = arith.addf %141, %142 : vector<16x128xf32>
    %c4_i32 = arith.constant 4 : i32
    %144 = tpu.dynamic_rotate %124 by %c4_i32 dim 1 : vector<16x128xf32>, i32 -> vector<16x128xf32>
    %145 = arith.addf %143, %144 : vector<16x128xf32>
    %146 = arith.addf %145, %129 : vector<16x128xf32>
    %c124_i32 = arith.constant 124 : i32
    %147 = tpu.dynamic_rotate %134 by %c124_i32 dim 1 : vector<16x128xf32>, i32 -> vector<16x128xf32>
    %148 = arith.addf %146, %147 : vector<16x128xf32>
    %c120_i32 = arith.constant 120 : i32
    %149 = tpu.dynamic_rotate %139 by %c120_i32 dim 1 : vector<16x128xf32>, i32 -> vector<16x128xf32>
    %150 = arith.addf %148, %149 : vector<16x128xf32>
    %c9 = arith.constant 9 : index
    %c0_30 = arith.constant 0 : index
    %151 = vector.load %arg8[%c9, %c0_30] : memref<34x128xf32, #tpu.memory_space<vmem>>, vector<16x128xf32>
    tpu.vector_store %arg8[%c9, %c0_30], %150 {strides = array<i32>} : memref<34x128xf32, #tpu.memory_space<vmem>>, vector<16x128xf32>,
    %c0_31 = arith.constant 0 : index
    %c0_32 = arith.constant 0 : index
    %152 = vector.load %arg8[%c0_31, %c0_32] : memref<34x128xf32, #tpu.memory_space<vmem>>, vector<16x128xf32>
    %153 = vector.extract_strided_slice %2 {offsets = [0, 0, 0], sizes = [1, 1, 128], strides = [1, 1, 1]} : vector<49x1x128xf32> to vector<1x1x128xf32>
    %154 = vector.shape_cast %153 : vector<1x1x128xf32> to vector<1x128xf32>
    %155 = vector.broadcast %154 : vector<1x128xf32> to vector<16x128xf32>
    %156 = arith.mulf %152, %155 : vector<16x128xf32>
    %157 = vector.extract_strided_slice %2 {offsets = [1, 0, 0], sizes = [1, 1, 128], strides = [1, 1, 1]} : vector<49x1x128xf32> to vector<1x1x128xf32>
    %158 = vector.shape_cast %157 : vector<1x1x128xf32> to vector<1x128xf32>
    %159 = vector.broadcast %158 : vector<1x128xf32> to vector<16x128xf32>
    %160 = arith.mulf %152, %159 : vector<16x128xf32>
    %161 = vector.extract_strided_slice %2 {offsets = [2, 0, 0], sizes = [1, 1, 128], strides = [1, 1, 1]} : vector<49x1x128xf32> to vector<1x1x128xf32>
    %162 = vector.shape_cast %161 : vector<1x1x128xf32> to vector<1x128xf32>
    %163 = vector.broadcast %162 : vector<1x128xf32> to vector<16x128xf32>
    %164 = arith.mulf %152, %163 : vector<16x128xf32>
    %165 = vector.extract_strided_slice %2 {offsets = [3, 0, 0], sizes = [1, 1, 128], strides = [1, 1, 1]} : vector<49x1x128xf32> to vector<1x1x128xf32>
    %166 = vector.shape_cast %165 : vector<1x1x128xf32> to vector<1x128xf32>
    %167 = vector.broadcast %166 : vector<1x128xf32> to vector<16x128xf32>
    %168 = arith.mulf %152, %167 : vector<16x128xf32>
    %169 = vector.extract_strided_slice %2 {offsets = [4, 0, 0], sizes = [1, 1, 128], strides = [1, 1, 1]} : vector<49x1x128xf32> to vector<1x1x128xf32>
    %170 = vector.shape_cast %169 : vector<1x1x128xf32> to vector<1x128xf32>
    %171 = vector.broadcast %170 : vector<1x128xf32> to vector<16x128xf32>
    %172 = arith.mulf %152, %171 : vector<16x128xf32>
    %173 = vector.extract_strided_slice %2 {offsets = [5, 0, 0], sizes = [1, 1, 128], strides = [1, 1, 1]} : vector<49x1x128xf32> to vector<1x1x128xf32>
    %174 = vector.shape_cast %173 : vector<1x1x128xf32> to vector<1x128xf32>
    %175 = vector.broadcast %174 : vector<1x128xf32> to vector<16x128xf32>
    %176 = arith.mulf %152, %175 : vector<16x128xf32>
    %177 = vector.extract_strided_slice %2 {offsets = [6, 0, 0], sizes = [1, 1, 128], strides = [1, 1, 1]} : vector<49x1x128xf32> to vector<1x1x128xf32>
    %178 = vector.shape_cast %177 : vector<1x1x128xf32> to vector<1x128xf32>
    %179 = vector.broadcast %178 : vector<1x128xf32> to vector<16x128xf32>
    %180 = arith.mulf %152, %179 : vector<16x128xf32>
    %c3_33 = arith.constant 3 : index
    %c0_34 = arith.constant 0 : index
    %181 = vector.load %arg8[%c3_33, %c0_34] : memref<34x128xf32, #tpu.memory_space<vmem>>, vector<16x128xf32>
    %182 = vector.extract_strided_slice %2 {offsets = [7, 0, 0], sizes = [1, 1, 128], strides = [1, 1, 1]} : vector<49x1x128xf32> to vector<1x1x128xf32>
    %183 = vector.shape_cast %182 : vector<1x1x128xf32> to vector<1x128xf32>
    %184 = vector.broadcast %183 : vector<1x128xf32> to vector<16x128xf32>
    %185 = arith.mulf %181, %184 : vector<16x128xf32>
    %186 = arith.addf %156, %185 : vector<16x128xf32>
    %187 = vector.extract_strided_slice %2 {offsets = [8, 0, 0], sizes = [1, 1, 128], strides = [1, 1, 1]} : vector<49x1x128xf32> to vector<1x1x128xf32>
    %188 = vector.shape_cast %187 : vector<1x1x128xf32> to vector<1x128xf32>
    %189 = vector.broadcast %188 : vector<1x128xf32> to vector<16x128xf32>
    %190 = arith.mulf %181, %189 : vector<16x128xf32>
    %191 = arith.addf %160, %190 : vector<16x128xf32>
    %192 = vector.extract_strided_slice %2 {offsets = [9, 0, 0], sizes = [1, 1, 128], strides = [1, 1, 1]} : vector<49x1x128xf32> to vector<1x1x128xf32>
    %193 = vector.shape_cast %192 : vector<1x1x128xf32> to vector<1x128xf32>
    %194 = vector.broadcast %193 : vector<1x128xf32> to vector<16x128xf32>
    %195 = arith.mulf %181, %194 : vector<16x128xf32>
    %196 = arith.addf %164, %195 : vector<16x128xf32>
    %197 = vector.extract_strided_slice %2 {offsets = [10, 0, 0], sizes = [1, 1, 128], strides = [1, 1, 1]} : vector<49x1x128xf32> to vector<1x1x128xf32>
    %198 = vector.shape_cast %197 : vector<1x1x128xf32> to vector<1x128xf32>
    %199 = vector.broadcast %198 : vector<1x128xf32> to vector<16x128xf32>
    %200 = arith.mulf %181, %199 : vector<16x128xf32>
    %201 = arith.addf %168, %200 : vector<16x128xf32>
    %202 = vector.extract_strided_slice %2 {offsets = [11, 0, 0], sizes = [1, 1, 128], strides = [1, 1, 1]} : vector<49x1x128xf32> to vector<1x1x128xf32>
    %203 = vector.shape_cast %202 : vector<1x1x128xf32> to vector<1x128xf32>
    %204 = vector.broadcast %203 : vector<1x128xf32> to vector<16x128xf32>
    %205 = arith.mulf %181, %204 : vector<16x128xf32>
    %206 = arith.addf %172, %205 : vector<16x128xf32>
    %207 = vector.extract_strided_slice %2 {offsets = [12, 0, 0], sizes = [1, 1, 128], strides = [1, 1, 1]} : vector<49x1x128xf32> to vector<1x1x128xf32>
    %208 = vector.shape_cast %207 : vector<1x1x128xf32> to vector<1x128xf32>
    %209 = vector.broadcast %208 : vector<1x128xf32> to vector<16x128xf32>
    %210 = arith.mulf %181, %209 : vector<16x128xf32>
    %211 = arith.addf %176, %210 : vector<16x128xf32>
    %212 = vector.extract_strided_slice %2 {offsets = [13, 0, 0], sizes = [1, 1, 128], strides = [1, 1, 1]} : vector<49x1x128xf32> to vector<1x1x128xf32>
    %213 = vector.shape_cast %212 : vector<1x1x128xf32> to vector<1x128xf32>
    %214 = vector.broadcast %213 : vector<1x128xf32> to vector<16x128xf32>
    %215 = arith.mulf %181, %214 : vector<16x128xf32>
    %216 = arith.addf %180, %215 : vector<16x128xf32>
    %c6 = arith.constant 6 : index
    %c0_35 = arith.constant 0 : index
    %217 = vector.load %arg8[%c6, %c0_35] : memref<34x128xf32, #tpu.memory_space<vmem>>, vector<16x128xf32>
    %218 = vector.extract_strided_slice %2 {offsets = [14, 0, 0], sizes = [1, 1, 128], strides = [1, 1, 1]} : vector<49x1x128xf32> to vector<1x1x128xf32>
    %219 = vector.shape_cast %218 : vector<1x1x128xf32> to vector<1x128xf32>
    %220 = vector.broadcast %219 : vector<1x128xf32> to vector<16x128xf32>
    %221 = arith.mulf %217, %220 : vector<16x128xf32>
    %222 = arith.addf %186, %221 : vector<16x128xf32>
    %223 = vector.extract_strided_slice %2 {offsets = [15, 0, 0], sizes = [1, 1, 128], strides = [1, 1, 1]} : vector<49x1x128xf32> to vector<1x1x128xf32>
    %224 = vector.shape_cast %223 : vector<1x1x128xf32> to vector<1x128xf32>
    %225 = vector.broadcast %224 : vector<1x128xf32> to vector<16x128xf32>
    %226 = arith.mulf %217, %225 : vector<16x128xf32>
    %227 = arith.addf %191, %226 : vector<16x128xf32>
    %228 = vector.extract_strided_slice %2 {offsets = [16, 0, 0], sizes = [1, 1, 128], strides = [1, 1, 1]} : vector<49x1x128xf32> to vector<1x1x128xf32>
    %229 = vector.shape_cast %228 : vector<1x1x128xf32> to vector<1x128xf32>
    %230 = vector.broadcast %229 : vector<1x128xf32> to vector<16x128xf32>
    %231 = arith.mulf %217, %230 : vector<16x128xf32>
    %232 = arith.addf %196, %231 : vector<16x128xf32>
    %233 = vector.extract_strided_slice %2 {offsets = [17, 0, 0], sizes = [1, 1, 128], strides = [1, 1, 1]} : vector<49x1x128xf32> to vector<1x1x128xf32>
    %234 = vector.shape_cast %233 : vector<1x1x128xf32> to vector<1x128xf32>
    %235 = vector.broadcast %234 : vector<1x128xf32> to vector<16x128xf32>
    %236 = arith.mulf %217, %235 : vector<16x128xf32>
    %237 = arith.addf %201, %236 : vector<16x128xf32>
    %238 = vector.extract_strided_slice %2 {offsets = [18, 0, 0], sizes = [1, 1, 128], strides = [1, 1, 1]} : vector<49x1x128xf32> to vector<1x1x128xf32>
    %239 = vector.shape_cast %238 : vector<1x1x128xf32> to vector<1x128xf32>
    %240 = vector.broadcast %239 : vector<1x128xf32> to vector<16x128xf32>
    %241 = arith.mulf %217, %240 : vector<16x128xf32>
    %242 = arith.addf %206, %241 : vector<16x128xf32>
    %243 = vector.extract_strided_slice %2 {offsets = [19, 0, 0], sizes = [1, 1, 128], strides = [1, 1, 1]} : vector<49x1x128xf32> to vector<1x1x128xf32>
    %244 = vector.shape_cast %243 : vector<1x1x128xf32> to vector<1x128xf32>
    %245 = vector.broadcast %244 : vector<1x128xf32> to vector<16x128xf32>
    %246 = arith.mulf %217, %245 : vector<16x128xf32>
    %247 = arith.addf %211, %246 : vector<16x128xf32>
    %248 = vector.extract_strided_slice %2 {offsets = [20, 0, 0], sizes = [1, 1, 128], strides = [1, 1, 1]} : vector<49x1x128xf32> to vector<1x1x128xf32>
    %249 = vector.shape_cast %248 : vector<1x1x128xf32> to vector<1x128xf32>
    %250 = vector.broadcast %249 : vector<1x128xf32> to vector<16x128xf32>
    %251 = arith.mulf %217, %250 : vector<16x128xf32>
    %252 = arith.addf %216, %251 : vector<16x128xf32>
    %c9_36 = arith.constant 9 : index
    %c0_37 = arith.constant 0 : index
    %253 = vector.load %arg8[%c9_36, %c0_37] : memref<34x128xf32, #tpu.memory_space<vmem>>, vector<16x128xf32>
    %254 = vector.extract_strided_slice %2 {offsets = [21, 0, 0], sizes = [1, 1, 128], strides = [1, 1, 1]} : vector<49x1x128xf32> to vector<1x1x128xf32>
    %255 = vector.shape_cast %254 : vector<1x1x128xf32> to vector<1x128xf32>
    %256 = vector.broadcast %255 : vector<1x128xf32> to vector<16x128xf32>
    %257 = arith.mulf %253, %256 : vector<16x128xf32>
    %258 = arith.addf %222, %257 : vector<16x128xf32>
    %259 = vector.extract_strided_slice %2 {offsets = [22, 0, 0], sizes = [1, 1, 128], strides = [1, 1, 1]} : vector<49x1x128xf32> to vector<1x1x128xf32>
    %260 = vector.shape_cast %259 : vector<1x1x128xf32> to vector<1x128xf32>
    %261 = vector.broadcast %260 : vector<1x128xf32> to vector<16x128xf32>
    %262 = arith.mulf %253, %261 : vector<16x128xf32>
    %263 = arith.addf %227, %262 : vector<16x128xf32>
    %264 = vector.extract_strided_slice %2 {offsets = [23, 0, 0], sizes = [1, 1, 128], strides = [1, 1, 1]} : vector<49x1x128xf32> to vector<1x1x128xf32>
    %265 = vector.shape_cast %264 : vector<1x1x128xf32> to vector<1x128xf32>
    %266 = vector.broadcast %265 : vector<1x128xf32> to vector<16x128xf32>
    %267 = arith.mulf %253, %266 : vector<16x128xf32>
    %268 = arith.addf %232, %267 : vector<16x128xf32>
    %269 = vector.extract_strided_slice %2 {offsets = [24, 0, 0], sizes = [1, 1, 128], strides = [1, 1, 1]} : vector<49x1x128xf32> to vector<1x1x128xf32>
    %270 = vector.shape_cast %269 : vector<1x1x128xf32> to vector<1x128xf32>
    %271 = vector.broadcast %270 : vector<1x128xf32> to vector<16x128xf32>
    %272 = arith.mulf %253, %271 : vector<16x128xf32>
    %273 = arith.addf %237, %272 : vector<16x128xf32>
    %274 = vector.extract_strided_slice %2 {offsets = [25, 0, 0], sizes = [1, 1, 128], strides = [1, 1, 1]} : vector<49x1x128xf32> to vector<1x1x128xf32>
    %275 = vector.shape_cast %274 : vector<1x1x128xf32> to vector<1x128xf32>
    %276 = vector.broadcast %275 : vector<1x128xf32> to vector<16x128xf32>
    %277 = arith.mulf %253, %276 : vector<16x128xf32>
    %278 = arith.addf %242, %277 : vector<16x128xf32>
    %279 = vector.extract_strided_slice %2 {offsets = [26, 0, 0], sizes = [1, 1, 128], strides = [1, 1, 1]} : vector<49x1x128xf32> to vector<1x1x128xf32>
    %280 = vector.shape_cast %279 : vector<1x1x128xf32> to vector<1x128xf32>
    %281 = vector.broadcast %280 : vector<1x128xf32> to vector<16x128xf32>
    %282 = arith.mulf %253, %281 : vector<16x128xf32>
    %283 = arith.addf %247, %282 : vector<16x128xf32>
    %284 = vector.extract_strided_slice %2 {offsets = [27, 0, 0], sizes = [1, 1, 128], strides = [1, 1, 1]} : vector<49x1x128xf32> to vector<1x1x128xf32>
    %285 = vector.shape_cast %284 : vector<1x1x128xf32> to vector<1x128xf32>
    %286 = vector.broadcast %285 : vector<1x128xf32> to vector<16x128xf32>
    %287 = arith.mulf %253, %286 : vector<16x128xf32>
    %288 = arith.addf %252, %287 : vector<16x128xf32>
    %c12 = arith.constant 12 : index
    %c0_38 = arith.constant 0 : index
    %289 = vector.load %arg8[%c12, %c0_38] : memref<34x128xf32, #tpu.memory_space<vmem>>, vector<16x128xf32>
    %290 = vector.extract_strided_slice %2 {offsets = [28, 0, 0], sizes = [1, 1, 128], strides = [1, 1, 1]} : vector<49x1x128xf32> to vector<1x1x128xf32>
    %291 = vector.shape_cast %290 : vector<1x1x128xf32> to vector<1x128xf32>
    %292 = vector.broadcast %291 : vector<1x128xf32> to vector<16x128xf32>
    %293 = arith.mulf %289, %292 : vector<16x128xf32>
    %294 = arith.addf %258, %293 : vector<16x128xf32>
    %295 = vector.extract_strided_slice %2 {offsets = [29, 0, 0], sizes = [1, 1, 128], strides = [1, 1, 1]} : vector<49x1x128xf32> to vector<1x1x128xf32>
    %296 = vector.shape_cast %295 : vector<1x1x128xf32> to vector<1x128xf32>
    %297 = vector.broadcast %296 : vector<1x128xf32> to vector<16x128xf32>
    %298 = arith.mulf %289, %297 : vector<16x128xf32>
    %299 = arith.addf %263, %298 : vector<16x128xf32>
    %300 = vector.extract_strided_slice %2 {offsets = [30, 0, 0], sizes = [1, 1, 128], strides = [1, 1, 1]} : vector<49x1x128xf32> to vector<1x1x128xf32>
    %301 = vector.shape_cast %300 : vector<1x1x128xf32> to vector<1x128xf32>
    %302 = vector.broadcast %301 : vector<1x128xf32> to vector<16x128xf32>
    %303 = arith.mulf %289, %302 : vector<16x128xf32>
    %304 = arith.addf %268, %303 : vector<16x128xf32>
    %305 = vector.extract_strided_slice %2 {offsets = [31, 0, 0], sizes = [1, 1, 128], strides = [1, 1, 1]} : vector<49x1x128xf32> to vector<1x1x128xf32>
    %306 = vector.shape_cast %305 : vector<1x1x128xf32> to vector<1x128xf32>
    %307 = vector.broadcast %306 : vector<1x128xf32> to vector<16x128xf32>
    %308 = arith.mulf %289, %307 : vector<16x128xf32>
    %309 = arith.addf %273, %308 : vector<16x128xf32>
    %310 = vector.extract_strided_slice %2 {offsets = [32, 0, 0], sizes = [1, 1, 128], strides = [1, 1, 1]} : vector<49x1x128xf32> to vector<1x1x128xf32>
    %311 = vector.shape_cast %310 : vector<1x1x128xf32> to vector<1x128xf32>
    %312 = vector.broadcast %311 : vector<1x128xf32> to vector<16x128xf32>
    %313 = arith.mulf %289, %312 : vector<16x128xf32>
    %314 = arith.addf %278, %313 : vector<16x128xf32>
    %315 = vector.extract_strided_slice %2 {offsets = [33, 0, 0], sizes = [1, 1, 128], strides = [1, 1, 1]} : vector<49x1x128xf32> to vector<1x1x128xf32>
    %316 = vector.shape_cast %315 : vector<1x1x128xf32> to vector<1x128xf32>
    %317 = vector.broadcast %316 : vector<1x128xf32> to vector<16x128xf32>
    %318 = arith.mulf %289, %317 : vector<16x128xf32>
    %319 = arith.addf %283, %318 : vector<16x128xf32>
    %320 = vector.extract_strided_slice %2 {offsets = [34, 0, 0], sizes = [1, 1, 128], strides = [1, 1, 1]} : vector<49x1x128xf32> to vector<1x1x128xf32>
    %321 = vector.shape_cast %320 : vector<1x1x128xf32> to vector<1x128xf32>
    %322 = vector.broadcast %321 : vector<1x128xf32> to vector<16x128xf32>
    %323 = arith.mulf %289, %322 : vector<16x128xf32>
    %324 = arith.addf %288, %323 : vector<16x128xf32>
    %c15 = arith.constant 15 : index
    %c0_39 = arith.constant 0 : index
    %325 = vector.load %arg8[%c15, %c0_39] : memref<34x128xf32, #tpu.memory_space<vmem>>, vector<16x128xf32>
    %326 = vector.extract_strided_slice %2 {offsets = [35, 0, 0], sizes = [1, 1, 128], strides = [1, 1, 1]} : vector<49x1x128xf32> to vector<1x1x128xf32>
    %327 = vector.shape_cast %326 : vector<1x1x128xf32> to vector<1x128xf32>
    %328 = vector.broadcast %327 : vector<1x128xf32> to vector<16x128xf32>
    %329 = arith.mulf %325, %328 : vector<16x128xf32>
    %330 = arith.addf %294, %329 : vector<16x128xf32>
    %331 = vector.extract_strided_slice %2 {offsets = [36, 0, 0], sizes = [1, 1, 128], strides = [1, 1, 1]} : vector<49x1x128xf32> to vector<1x1x128xf32>
    %332 = vector.shape_cast %331 : vector<1x1x128xf32> to vector<1x128xf32>
    %333 = vector.broadcast %332 : vector<1x128xf32> to vector<16x128xf32>
    %334 = arith.mulf %325, %333 : vector<16x128xf32>
    %335 = arith.addf %299, %334 : vector<16x128xf32>
    %336 = vector.extract_strided_slice %2 {offsets = [37, 0, 0], sizes = [1, 1, 128], strides = [1, 1, 1]} : vector<49x1x128xf32> to vector<1x1x128xf32>
    %337 = vector.shape_cast %336 : vector<1x1x128xf32> to vector<1x128xf32>
    %338 = vector.broadcast %337 : vector<1x128xf32> to vector<16x128xf32>
    %339 = arith.mulf %325, %338 : vector<16x128xf32>
    %340 = arith.addf %304, %339 : vector<16x128xf32>
    %341 = vector.extract_strided_slice %2 {offsets = [38, 0, 0], sizes = [1, 1, 128], strides = [1, 1, 1]} : vector<49x1x128xf32> to vector<1x1x128xf32>
    %342 = vector.shape_cast %341 : vector<1x1x128xf32> to vector<1x128xf32>
    %343 = vector.broadcast %342 : vector<1x128xf32> to vector<16x128xf32>
    %344 = arith.mulf %325, %343 : vector<16x128xf32>
    %345 = arith.addf %309, %344 : vector<16x128xf32>
    %346 = vector.extract_strided_slice %2 {offsets = [39, 0, 0], sizes = [1, 1, 128], strides = [1, 1, 1]} : vector<49x1x128xf32> to vector<1x1x128xf32>
    %347 = vector.shape_cast %346 : vector<1x1x128xf32> to vector<1x128xf32>
    %348 = vector.broadcast %347 : vector<1x128xf32> to vector<16x128xf32>
    %349 = arith.mulf %325, %348 : vector<16x128xf32>
    %350 = arith.addf %314, %349 : vector<16x128xf32>
    %351 = vector.extract_strided_slice %2 {offsets = [40, 0, 0], sizes = [1, 1, 128], strides = [1, 1, 1]} : vector<49x1x128xf32> to vector<1x1x128xf32>
    %352 = vector.shape_cast %351 : vector<1x1x128xf32> to vector<1x128xf32>
    %353 = vector.broadcast %352 : vector<1x128xf32> to vector<16x128xf32>
    %354 = arith.mulf %325, %353 : vector<16x128xf32>
    %355 = arith.addf %319, %354 : vector<16x128xf32>
    %356 = vector.extract_strided_slice %2 {offsets = [41, 0, 0], sizes = [1, 1, 128], strides = [1, 1, 1]} : vector<49x1x128xf32> to vector<1x1x128xf32>
    %357 = vector.shape_cast %356 : vector<1x1x128xf32> to vector<1x128xf32>
    %358 = vector.broadcast %357 : vector<1x128xf32> to vector<16x128xf32>
    %359 = arith.mulf %325, %358 : vector<16x128xf32>
    %360 = arith.addf %324, %359 : vector<16x128xf32>
    %c18_40 = arith.constant 18 : index
    %c0_41 = arith.constant 0 : index
    %361 = vector.load %arg8[%c18_40, %c0_41] : memref<34x128xf32, #tpu.memory_space<vmem>>, vector<16x128xf32>
    %362 = vector.extract_strided_slice %2 {offsets = [42, 0, 0], sizes = [1, 1, 128], strides = [1, 1, 1]} : vector<49x1x128xf32> to vector<1x1x128xf32>
    %363 = vector.shape_cast %362 : vector<1x1x128xf32> to vector<1x128xf32>
    %364 = vector.broadcast %363 : vector<1x128xf32> to vector<16x128xf32>
    %365 = arith.mulf %361, %364 : vector<16x128xf32>
    %366 = arith.addf %330, %365 : vector<16x128xf32>
    %367 = vector.extract_strided_slice %2 {offsets = [43, 0, 0], sizes = [1, 1, 128], strides = [1, 1, 1]} : vector<49x1x128xf32> to vector<1x1x128xf32>
    %368 = vector.shape_cast %367 : vector<1x1x128xf32> to vector<1x128xf32>
    %369 = vector.broadcast %368 : vector<1x128xf32> to vector<16x128xf32>
    %370 = arith.mulf %361, %369 : vector<16x128xf32>
    %371 = arith.addf %335, %370 : vector<16x128xf32>
    %372 = vector.extract_strided_slice %2 {offsets = [44, 0, 0], sizes = [1, 1, 128], strides = [1, 1, 1]} : vector<49x1x128xf32> to vector<1x1x128xf32>
    %373 = vector.shape_cast %372 : vector<1x1x128xf32> to vector<1x128xf32>
    %374 = vector.broadcast %373 : vector<1x128xf32> to vector<16x128xf32>
    %375 = arith.mulf %361, %374 : vector<16x128xf32>
    %376 = arith.addf %340, %375 : vector<16x128xf32>
    %377 = vector.extract_strided_slice %2 {offsets = [45, 0, 0], sizes = [1, 1, 128], strides = [1, 1, 1]} : vector<49x1x128xf32> to vector<1x1x128xf32>
    %378 = vector.shape_cast %377 : vector<1x1x128xf32> to vector<1x128xf32>
    %379 = vector.broadcast %378 : vector<1x128xf32> to vector<16x128xf32>
    %380 = arith.mulf %361, %379 : vector<16x128xf32>
    %381 = arith.addf %345, %380 : vector<16x128xf32>
    %382 = vector.extract_strided_slice %2 {offsets = [46, 0, 0], sizes = [1, 1, 128], strides = [1, 1, 1]} : vector<49x1x128xf32> to vector<1x1x128xf32>
    %383 = vector.shape_cast %382 : vector<1x1x128xf32> to vector<1x128xf32>
    %384 = vector.broadcast %383 : vector<1x128xf32> to vector<16x128xf32>
    %385 = arith.mulf %361, %384 : vector<16x128xf32>
    %386 = arith.addf %350, %385 : vector<16x128xf32>
    %387 = vector.extract_strided_slice %2 {offsets = [47, 0, 0], sizes = [1, 1, 128], strides = [1, 1, 1]} : vector<49x1x128xf32> to vector<1x1x128xf32>
    %388 = vector.shape_cast %387 : vector<1x1x128xf32> to vector<1x128xf32>
    %389 = vector.broadcast %388 : vector<1x128xf32> to vector<16x128xf32>
    %390 = arith.mulf %361, %389 : vector<16x128xf32>
    %391 = arith.addf %355, %390 : vector<16x128xf32>
    %392 = vector.extract_strided_slice %2 {offsets = [48, 0, 0], sizes = [1, 1, 128], strides = [1, 1, 1]} : vector<49x1x128xf32> to vector<1x1x128xf32>
    %393 = vector.shape_cast %392 : vector<1x1x128xf32> to vector<1x128xf32>
    %394 = vector.broadcast %393 : vector<1x128xf32> to vector<16x128xf32>
    %395 = arith.mulf %361, %394 : vector<16x128xf32>
    %396 = arith.addf %360, %395 : vector<16x128xf32>
    %397 = vector.shape_cast %4 : vector<1x128xf32> to vector<1x128xf32>
    %398 = vector.broadcast %397 : vector<1x128xf32> to vector<16x128xf32>
    %c36_i32 = arith.constant 36 : i32
    %399 = tpu.dynamic_rotate %366 by %c36_i32 dim 1 : vector<16x128xf32>, i32 -> vector<16x128xf32>
    %400 = arith.addf %398, %399 : vector<16x128xf32>
    %c24_i32 = arith.constant 24 : i32
    %401 = tpu.dynamic_rotate %371 by %c24_i32 dim 1 : vector<16x128xf32>, i32 -> vector<16x128xf32>
    %402 = arith.addf %400, %401 : vector<16x128xf32>
    %c12_i32 = arith.constant 12 : i32
    %403 = tpu.dynamic_rotate %376 by %c12_i32 dim 1 : vector<16x128xf32>, i32 -> vector<16x128xf32>
    %404 = arith.addf %402, %403 : vector<16x128xf32>
    %405 = arith.addf %404, %381 : vector<16x128xf32>
    %c116_i32 = arith.constant 116 : i32
    %406 = tpu.dynamic_rotate %386 by %c116_i32 dim 1 : vector<16x128xf32>, i32 -> vector<16x128xf32>
    %407 = arith.addf %405, %406 : vector<16x128xf32>
    %c104_i32 = arith.constant 104 : i32
    %408 = tpu.dynamic_rotate %391 by %c104_i32 dim 1 : vector<16x128xf32>, i32 -> vector<16x128xf32>
    %409 = arith.addf %407, %408 : vector<16x128xf32>
    %c92_i32 = arith.constant 92 : i32
    %410 = tpu.dynamic_rotate %396 by %c92_i32 dim 1 : vector<16x128xf32>, i32 -> vector<16x128xf32>
    %411 = arith.addf %409, %410 : vector<16x128xf32>
    %412 = arith.truncf %411 : vector<16x128xf32> to vector<16x128xbf16>
    %c0_42 = arith.constant 0 : index
    %c0_43 = arith.constant 0 : index
    %413 = vector.load %arg4[%c0_42, %c0_43] : memref<128x128xbf16, #tpu.memory_space<vmem>>, vector<128x128xbf16>
    %cst_44 = arith.constant dense<0.000000e+00> : vector<16x128xf32>
    %414 = tpu.matmul %412, %413, %cst_44 {dimension_numbers = #tpu.dot_dimension_numbers<[1], [0], [0], [1], [0, 0, 1, 1], [], []>} : vector<16x128xbf16>, vector<128x128xbf16>, vector<16x128xf32> -> vector<16x128xf32>
    %415 = vector.broadcast %5 : vector<1x128xf32> to vector<16x128xf32>
    %416 = arith.addf %414, %415 : vector<16x128xf32>
    %417 = arith.mulf %0, %416 : vector<16x128xf32>
    %c0_45 = arith.constant 0 : index
    %c0_46 = arith.constant 0 : index
    %418 = vector.load %arg6[%c0_45, %c0_46] : memref<16x128xf32, #tpu.memory_space<vmem>>, vector<16x128xf32>
    tpu.vector_store %arg6[%c0_45, %c0_46], %417 {strides = array<i32>} : memref<16x128xf32, #tpu.memory_space<vmem>>, vector<16x128xf32>,
    return
  }
  func.func @transform_0(%arg0: i32) -> (i32, i32) {
    %c0_i32 = arith.constant 0 : i32
    %c0_i32_0 = arith.constant 0 : i32
    %c0_i32_1 = arith.constant 0 : i32
    return %c0_i32, %c0_i32_0 : i32, i32
  }
  func.func @transform_1(%arg0: i32) -> (i32, i32, i32) {
    %c0_i32 = arith.constant 0 : i32
    %c0_i32_0 = arith.constant 0 : i32
    %c0_i32_1 = arith.constant 0 : i32
    %c0_i32_2 = arith.constant 0 : i32
    return %c0_i32, %c0_i32_0, %c0_i32_1 : i32, i32, i32
  }
  func.func @transform_2(%arg0: i32) -> (i32, i32, i32) {
    %c0_i32 = arith.constant 0 : i32
    %c0_i32_0 = arith.constant 0 : i32
    %c0_i32_1 = arith.constant 0 : i32
    %c0_i32_2 = arith.constant 0 : i32
    return %c0_i32, %c0_i32_0, %c0_i32_1 : i32, i32, i32
  }
  func.func @transform_3(%arg0: i32) -> (i32, i32) {
    %c0_i32 = arith.constant 0 : i32
    %c0_i32_0 = arith.constant 0 : i32
    %c0_i32_1 = arith.constant 0 : i32
    return %c0_i32, %c0_i32_0 : i32, i32
  }
  func.func @transform_4(%arg0: i32) -> (i32, i32) {
    %c0_i32 = arith.constant 0 : i32
    %c0_i32_0 = arith.constant 0 : i32
    %c0_i32_1 = arith.constant 0 : i32
    return %c0_i32, %c0_i32_0 : i32, i32
  }
  func.func @transform_5(%arg0: i32) -> (i32, i32) {
    %c0_i32 = arith.constant 0 : i32
    %c0_i32_0 = arith.constant 0 : i32
    %c0_i32_1 = arith.constant 0 : i32
    return %c0_i32, %c0_i32_0 : i32, i32
  }
}

</mosaic_0001>

<bundles_post_ra>
// kernel: tpu_custom_call.1
= control target key start
LH: loop header
LB: loop body
LE: loop exit
PB: predicated region body
PF: predicated region fallthrough
CT: control target
= control target key end

     0   :  { %10 = vsyncpa [#allocation5], 0  ;;  %s1561_s0 = inlined_call_operand.hbm [shape: f32[16,128], index: 0, kind: input, shape index: {}]   ;;  %s1562_s1 = inlined_call_operand.hbm [shape: f32[25,1,128], index: 1, kind: input, shape index: {}]   ;;  %s1563_s2 = inlined_call_operand.hbm [shape: f32[49,1,128], index: 2, kind: input, shape index: {}]   ;;  %s1564_s3 = inlined_call_operand.hbm [shape: bf16[128,128], index: 3, kind: input, shape index: {}]   ;;  %s1565_s4 = inlined_call_operand.hbm [shape: f32[3,128], index: 4, kind: input, shape index: {}]   ;;  %s1566_s5 = inlined_call_operand.hbm [shape: f32[16,128], index: 5, kind: output, shape index: {}]  }
   0x1   :  { %11 = vsyncpa [#allocation8], 0 }
   0x2   :  { %12 = vsyncpa [#allocation11], 0  ;;  %s31_s20 = sshll.u32 %s1562_s1, 4  ;;  %s32_s20 = int_to_ptr.hbm [resolvable:$true] %s31_s20 }
   0x3   :  { %13 = vsyncpa [#allocation6], 0  ;;  %s1167_s21 = smov [#allocation7]   ;;  %s57_s25 = sshll.u32 %s1564_s3, 4  ;;  %s58_s25 = int_to_ptr.hbm [resolvable:$true] %s57_s25 }
   0x4   :  { %s33_s22 = sshll.u32 %s1167_s21, 4  ;;  %s1168_s26 = smov 16   ;;  %s34_s22 = int_to_ptr.vmem [resolvable:$true] %s33_s22 }
   0x5   :  { %s1169_s27 = smov 1   ;;  %s1170_s28 = smov [#allocation10]  }
   0x6   :  { %39 = dma.hbm_to_vmem [thread:$0]  %s32_s20, 400, %s34_s22, [#allocation8], %s1168_s26, %s1168_s26, %s1169_s27  }
   0x7   :  { %s59_s29 = sshll.u32 %s1170_s28, 4  ;;  %s1171_s30 = smov 64   ;;  %s60_s29 = int_to_ptr.vmem [resolvable:$true] %s59_s29 }
   0x8   :  { %s1172_s6 = smov 4   ;;  %s18_s8 = sshll.u32 %s1561_s0, 4  ;;  %s19_s8 = int_to_ptr.hbm [resolvable:$true] %s18_s8 }
   0x9   :  { %65 = dma.hbm_to_vmem [thread:$0]  %s58_s25, 1024, %s60_s29, [#allocation11], %s1171_s30, %s1171_s30, %s1172_s6  }
   0xa   :  { %s1173_s9 = smov [#allocation4]   ;;  %s44_s12 = sshll.u32 %s1563_s2, 4  ;;  %s45_s12 = int_to_ptr.hbm [resolvable:$true] %s44_s12 }
   0xb   :  { %s20_s10 = sshll.u32 %s1173_s9, 4  ;;  %s1174_s13 = smov 128   ;;  %s21_s10 = int_to_ptr.vmem [resolvable:$true] %s20_s10 }
   0xc   :  { %s1175_s14 = smov 8   ;;  %s1176_s15 = smov [#allocation9]  }
   0xd   :  { %26 = dma.hbm_to_vmem [thread:$0]  %s19_s8, 256, %s21_s10, [#allocation5], %s1174_s13, %s1174_s13, %s1175_s14  }
   0xe   :  { %s46_s16 = sshll.u32 %s1176_s15, 4  ;;  %s71_s0 = sshll.u32 %s1565_s4, 4  ;;  %s47_s16 = int_to_ptr.vmem [resolvable:$true] %s46_s16  ;;  %s72_s0 = int_to_ptr.hbm [resolvable:$true] %s71_s0 }
   0xf   :  { %52 = dma.hbm_to_vmem [thread:$0]  %s45_s12, 784, %s47_s16, [#allocation8], %s1168_s26, %s1168_s26, %s1169_s27  }
  0x10   :  { %s1177_s19 = smov [#allocation12]  }
  0x11   :  { %s73_s20 = sshll.u32 %s1177_s19, 4  ;;  %s74_s20 = int_to_ptr.vmem [resolvable:$true] %s73_s20 }
  0x12   :  { %76 = dma.hbm_to_vmem [thread:$0]  %s72_s0, 64, %s74_s20, [#allocation11]  }
  0x13   :  { %1159 = dma.done.wait [#allocation5], 256  }
  0x14   :  { %1160 = vsyncadd [#allocation5], 4294967040 }
  0x15   :  { %1161 = dma.done.wait [#allocation8], 1184  }
  0x16   :  { %1162 = vsyncadd [#allocation8], 4294966112 }
  0x17   :  { %1163 = dma.done.wait [#allocation11], 1088  }
  0x18   :  { %1164 = vsyncadd [#allocation11], 4294966208  ;;  %v1178_v0 = vmov 0.0   ;;  %v1237_v1 = vld [vmem:[#allocation4] sm:$0xff]  ;;  %v1239_v2 = vld [vmem:[#allocation4 + $0x8] sm:$0xff]  ;;  %s1179_s2 = smov 124  }
  0x19   :  { %176 = vst [vmem:[#allocation2] sm:$0x3] %v1178_v0  ;;  %v936_v3 = vld [vmem:[#allocation7 + $0x1] ss:$0 sm:$0xff]  ;;  %v937_v4 = vld [vmem:[#allocation7 + $0x6] ss:$0 sm:$0xff] }
  0x1a   :  { %177 = vst [vmem:[#allocation2 + $0x12] sm:$0x3] %v1178_v0  ;;  %v938_v5 = vld [vmem:[#allocation7 + $0xb] ss:$0 sm:$0xff]  ;;  %v939_v6 = vld [vmem:[#allocation7 + $0x10] ss:$0 sm:$0xff] }
  0x1b   :  { %180 = vst [vmem:[#allocation3] sm:$0xff] %v1178_v0  ;;  %v941_v7 = vld [vmem:[#allocation7] ss:$0 sm:$0xff]  ;;  %v942_v8 = vld [vmem:[#allocation7 + $0x5] ss:$0 sm:$0xff]  ;;  %v260_v15 = vmul.f32 %v938_v5, %v1237_v1  ;;  %v261_v27 = vmul.f32 %v938_v5, %v1239_v2  ;;  %s1180_s4 = smov 120  }
  0x1c   :  { %181 = vst [vmem:[#allocation3 + $0x8] sm:$0x1] %v1178_v0  ;;  %v940_v9 = vld [vmem:[#allocation7 + $0x15] ss:$0 sm:$0xff]  ;;  %v943_v10 = vld [vmem:[#allocation7 + $0xa] ss:$0 sm:$0xff] }
  0x1d   :  { %182 = vst [vmem:[#allocation3 + $0x19] sm:$0xff] %v1178_v0  ;;  %v944_v11 = vld [vmem:[#allocation7 + $0xf] ss:$0 sm:$0xff]  ;;  %v945_v12 = vld [vmem:[#allocation7 + $0x14] ss:$0 sm:$0xff]  ;;  %v253_v16 = vmul.f32 %v943_v10, %v1237_v1  ;;  %v254_v29 = vmul.f32 %v943_v10, %v1239_v2  ;;  %s1181_s21 = smov 24  }
  0x1e   :  { %183 = vst [vmem:[#allocation3 + $0x21] sm:$0x1] %v1178_v0  ;;  %v946_v34 = vld [vmem:[#allocation7 + $0x4] ss:$0 sm:$0xff]  ;;  %v947_v35 = vld [vmem:[#allocation7 + $0x9] ss:$0 sm:$0xff] }
  0x1f   :  { %178 = vst [vmem:[#allocation2 + $0x2] sm:$0xff] %v1237_v1  ;;  %v948_v41 = vld [vmem:[#allocation7 + $0xe] ss:$0 sm:$0xff]  ;;  %v949_v53 = vld [vmem:[#allocation7 + $0x13] ss:$0 sm:$0xff]  ;;  %s1182_s22 = smov 36  }
  0x20   :  { %179 = vst [vmem:[#allocation2 + $0xa] sm:$0xff] %v1239_v2  ;;  %v951_v54 = vld [vmem:[#allocation7 + $0x3] ss:$0 sm:$0xff]  ;;  %v952_v55 = vld [vmem:[#allocation7 + $0x8] ss:$0 sm:$0xff]  ;;  %v282_v59 = vmul.f32 %v948_v41, %v1239_v2  ;;  %s1183_s23 = smov 12  }
  0x21   :  { %v953_v60 = vld [vmem:[#allocation7 + $0xd] ss:$0 sm:$0xff]  ;;  %v950_v10 = vld [vmem:[#allocation7 + $0x18] ss:$0 sm:$0xff]  ;;  %s1184_s24 = smov 104   ;;  %s1185_s25 = smov 116  }
  0x22   :  { %s1186_s26 = smov 92   ;;  %s1187_s27 = smov [#allocation13]  }
  0x23   :  { %s858_s28 = sshll.u32 %s1187_s27, 4  ;;  %s859_s28 = int_to_ptr.vmem [resolvable:$true] %s858_s28 }
  0x26   :  { %v1243_v13 = vld [vmem:[#allocation2] sm:$0xff] }
  0x27   :  { %v1245_v14 = vld [vmem:[#allocation2 + $0x1] sm:$0xff]  ;;  %v194_v17 = vmul.f32 %v936_v3, %v1243_v13  ;;  %v189_v21 = vmul.f32 %v941_v7, %v1243_v13  ;;  %v1261_v26 = vld [vmem:[#allocation2 + $0x9] sm:$0xff]  ;;  %v209_v0 = vmul.f32 %v946_v34, %v1243_v13 }
  0x28   :  { %v223_v18 = vmul.f32 %v937_v4, %v1245_v14  ;;  %v1251_v19 = vld [vmem:[#allocation2 + $0x3] sm:$0xff]  ;;  %v216_v22 = vmul.f32 %v942_v8, %v1245_v14  ;;  %v1264_v28 = vld [vmem:[#allocation2 + $0xb] sm:$0xff]  ;;  %v224_v33 = vmul.f32 %v937_v4, %v1261_v26  ;;  %v217_v40 = vmul.f32 %v942_v8, %v1261_v26 }
  0x29   :  { %v1253_v20 = vld [vmem:[#allocation2 + $0x4] sm:$0xff]  ;;  %v297_v24 = vmul.f32 %v939_v6, %v1251_v19  ;;  %v290_v25 = vmul.f32 %v944_v11, %v1251_v19  ;;  %v1271_v38 = vld [vmem:[#allocation2 + $0xc] sm:$0xff]  ;;  %v298_v45 = vmul.f32 %v939_v6, %v1264_v28  ;;  %v291_v47 = vmul.f32 %v944_v11, %v1264_v28 }
  0x2a   :  { %v1257_v23 = vld [vmem:[#allocation2 + $0x8] sm:$0xff]  ;;  %v225_v30 = vadd.f32 %v223_v18, %v194_v17  ;;  %v218_v31 = vadd.f32 %v216_v22, %v189_v21  ;;  %v334_v36 = vmul.f32 %v940_v9, %v1253_v20  ;;  %v327_v37 = vmul.f32 %v945_v12, %v1253_v20  ;;  %v955_v8 = vld [vmem:[#allocation7 + $0x17] ss:$0 sm:$0xff] }
  0x2b   :  { %v195_v32 = vmul.f32 %v936_v3, %v1257_v23  ;;  %v190_v39 = vmul.f32 %v941_v7, %v1257_v23  ;;  %v210_v48 = vmul.f32 %v946_v34, %v1257_v23  ;;  %v245_v49 = vmul.f32 %v947_v35, %v1261_v26  ;;  %v954_v3 = vld [vmem:[#allocation7 + $0x12] ss:$0 sm:$0xff] }
  0x2c   :  { %v262_v42 = vadd.f32 %v260_v15, %v225_v30  ;;  %v255_v43 = vadd.f32 %v253_v16, %v218_v31  ;;  %v335_v56 = vmul.f32 %v940_v9, %v1271_v38  ;;  %v328_v5 = vmul.f32 %v945_v12, %v1271_v38 }
  0x2d   :  { %v226_v44 = vadd.f32 %v224_v33, %v195_v32  ;;  %v219_v46 = vadd.f32 %v217_v40, %v190_v39  ;;  %v247_v58 = vadd.f32 %v245_v49, %v210_v48  ;;  %v244_v6 = vmul.f32 %v947_v35, %v1245_v14  ;;  %v957_v49 = vld [vmem:[#allocation7 + $0x2] ss:$0 sm:$0xff] }
  0x2e   :  { %v299_v50 = vadd.f32 %v297_v24, %v262_v42  ;;  %v292_v51 = vadd.f32 %v290_v25, %v255_v43  ;;  %v281_v7 = vmul.f32 %v948_v41, %v1237_v1  ;;  %v319_v9 = vmul.f32 %v949_v53, %v1264_v28 }
  0x2f   :  { %v263_v52 = vadd.f32 %v261_v27, %v226_v44  ;;  %v256_v57 = vadd.f32 %v254_v29, %v219_v46  ;;  %v246_v11 = vadd.f32 %v244_v6, %v209_v0  ;;  %v204_v15 = vmul.f32 %v951_v54, %v1243_v13 }
  0x30   :  { %v336_v61 = vadd.f32 %v334_v36, %v299_v50  ;;  %v329_v62 = vadd.f32 %v327_v37, %v292_v51  ;;  %v284_v17 = vadd.f32 %v282_v59, %v247_v58  ;;  %v237_v18 = vmul.f32 %v952_v55, %v1245_v14  ;;  %v958_v50 = vld [vmem:[#allocation7 + $0x7] ss:$0 sm:$0xff] }
  0x31   :  { %v300_v63 = vadd.f32 %v298_v45, %v263_v52  ;;  %v293_v4 = vadd.f32 %v291_v47, %v256_v57  ;;  %v274_v12 = vmul.f32 %v953_v60, %v1237_v1  ;;  %v318_v22 = vmul.f32 %v949_v53, %v1251_v19  ;;  %v959_v52 = vld [vmem:[#allocation7 + $0xc] ss:$0 sm:$0xff]  ;;  %v960_v57 = vld [vmem:[#allocation7 + $0x11] ss:$0 sm:$0xff] }
  0x32   :  { %366 = vrot.lane.b32.xlu1 %v336_v61, %s1172_s6  ;;  %360 = vrot.lane.b32.xlu0 %v329_v62, %s1175_s14  ;;  %v205_v24 = vmul.f32 %v951_v54, %v1257_v23  ;;  %v238_v25 = vmul.f32 %v952_v55, %v1261_v26  ;;  %v283_v27 = vadd.f32 %v281_v7, %v246_v11  ;;  %v956_v61 = vld [vmem:[#allocation12] ss:$0 sm:$0xff] }
  0x33   :  { %v337_v16 = vadd.f32 %v335_v56, %v300_v63  ;;  %v330_v21 = vadd.f32 %v328_v5, %v293_v4  ;;  %v239_v29 = vadd.f32 %v237_v18, %v204_v15  ;;  %v311_v30 = vmul.f32 %v954_v3, %v1251_v19  ;;  %v961_v63 = vld [vmem:[#allocation7 + $0x16] ss:$0 sm:$0xff] }
  0x34   :  { %v275_v31 = vmul.f32 %v953_v60, %v1239_v2  ;;  %v240_v32 = vadd.f32 %v238_v25, %v205_v24  ;;  %v348_v34 = vmul.f32 %v955_v8, %v1253_v20  ;;  %v321_v35 = vadd.f32 %v319_v9, %v284_v17  ;;  %v1317_v25 = vld [vmem:[#allocation9 + $0x1] ss:$0 sm:$0xff] }
  0x35   :  { %v276_v33 = vadd.f32 %v274_v12, %v239_v29  ;;  %v356_v36 = vmul.f32 %v950_v10, %v1271_v38  ;;  %v355_v37 = vmul.f32 %v950_v10, %v1253_v20  ;;  %v312_v39 = vmul.f32 %v954_v3, %v1264_v28  ;;  %v1322_v29 = vld [vmem:[#allocation9 + $0x2] ss:$0 sm:$0xff] }
  0x36   :  { %v320_v40 = vadd.f32 %v318_v22, %v283_v27  ;;  %v277_v42 = vadd.f32 %v275_v31, %v240_v32  ;;  %v349_v47 = vmul.f32 %v955_v8, %v1271_v38  ;;  %v230_v51 = vmul.f32 %v958_v50, %v1245_v14  ;;  %v1319_v27 = vld [vmem:[#allocation9] ss:$0 sm:$0xff]  ;;  %v972_v31 = vld [vmem:[#allocation9 + $0x15] ss:$0 sm:$0xff]  ;;  %v1327_v32 = vld [vmem:[#allocation3 + $0x1a] sm:$0xff] }
  0x37   :  { %v313_v41 = vadd.f32 %v311_v30, %v276_v33  ;;  %v358_v44 = vadd.f32 %v356_v36, %v321_v35  ;;  %v199_v53 = vmul.f32 %v957_v49, %v1243_v13  ;;  %v200_v54 = vmul.f32 %v957_v49, %v1257_v23  ;;  %v1324_v30 = vld [vmem:[#allocation9 + $0x5] ss:$0 sm:$0xff]  ;;  %v1329_v33 = vld [vmem:[#allocation9 + $0x4] ss:$0 sm:$0xff]  ;;  %v975_v35 = vld [vmem:[#allocation9 + $0x2a] ss:$0 sm:$0xff] }
  0x38   :  { %v357_v45 = vadd.f32 %v355_v37, %v320_v40  ;;  %v314_v46 = vadd.f32 %v312_v39, %v277_v42  ;;  %v231_v55 = vmul.f32 %v958_v50, %v1261_v26  ;;  %v267_v56 = vmul.f32 %v959_v52, %v1237_v1  ;;  %1572 = vst [vmem:[#allocation20_spill] sm:$0xff] %v1324_v30  ;;  %v979_v36 = vld [vmem:[#allocation9 + $0x17] ss:$0 sm:$0xff]  ;;  %v1332_v39 = vld [vmem:[#allocation9 + $0x2c] ss:$0 sm:$0xff] }
  0x39   :  { %v350_v43 = vadd.f32 %v348_v34, %v313_v41  ;;  %v232_v58 = vadd.f32 %v230_v51, %v199_v53  ;;  %v268_v60 = vmul.f32 %v959_v52, %v1239_v2  ;;  %v304_v62 = vmul.f32 %v960_v57, %v1251_v19  ;;  %v968_v34 = vld [vmem:[#allocation9 + $0x2b] ss:$0 sm:$0xff]  ;;  %v986_v40 = vld [vmem:[#allocation9 + $0x1a] ss:$0 sm:$0xff]  ;;  %v993_v41 = vld [vmem:[#allocation9 + $0x19] ss:$0 sm:$0xff] }
  0x3a   :  { %368 = vrot.lane.b32.xlu1 %v337_v16, %s1172_s6  ;;  %362 = vrot.lane.b32.xlu0 %v330_v21, %s1175_s14  ;;  %v351_v48 = vadd.f32 %v349_v47, %v314_v46  ;;  %v233_v59 = vadd.f32 %v231_v55, %v200_v54  ;;  %v305_v13 = vmul.f32 %v960_v57, %v1264_v28  ;;  %v398_v37 = vmul.f32 0.0, %v1317_v25  ;;  %v1334_v42 = vld [vmem:[#allocation9 + $0x8] ss:$0 sm:$0xff]  ;;  %v1346_v47 = vld [vmem:[#allocation9 + $0x6] ss:$0 sm:$0xff]  ;;  %s860_s6 = sshll.u32 %s1566_s5, 4  ;;  %s861_s6 = int_to_ptr.hbm [resolvable:$true] %s860_s6 }
  0x3b   :  { %374 = vrot.lane.b32.xlu2 %v350_v43, %s1179_s2  ;;  %v269_v0 = vadd.f32 %v267_v56, %v232_v58  ;;  %v341_v26 = vmul.f32 %v961_v63, %v1253_v20  ;;  %v342_v7 = vmul.f32 %v961_v63, %v1271_v38  ;;  %v965_v38 = vld [vmem:[#allocation9 + $0x16] ss:$0 sm:$0xff]  ;;  %v393_v43 = vmul.f32 0.0, %v1319_v27  ;;  %v1348_v49 = vld [vmem:[#allocation9 + $0xf] ss:$0 sm:$0xff] }
  0x3c   :  { %v270_v4 = vadd.f32 %v268_v60, %v233_v59  ;;  %v1344_v46 = vmul.f32 0.0, %v1324_v30  ;;  %v970_v51 = vld [vmem:[#allocation9 + $0x7] ss:$0 sm:$0xff]  ;;  %v971_v52 = vld [vmem:[#allocation9 + $0xe] ss:$0 sm:$0xff]  ;;  %v1353_v53 = vmul.f32 %v1332_v39, %v1327_v32  ;;  %v1356_v54 = vmul.f32 %v968_v34, %v1327_v32 }
  0x3d   :  { %v306_v1 = vadd.f32 %v304_v62, %v269_v0  ;;  %v1359_v55 = vmul.f32 0.0, %v1329_v33  ;;  %v1361_v56 = vld [vmem:[#allocation9 + $0x1d] ss:$0 sm:$0xff]  ;;  %v1363_v57 = vld [vmem:[#allocation9 + $0x24] ss:$0 sm:$0xff] }
  0x3e   :  { %v307_v6 = vadd.f32 %v305_v13, %v270_v4  ;;  %v973_v59 = vld [vmem:[#allocation9 + $0x1c] ss:$0 sm:$0xff]  ;;  %v974_v60 = vld [vmem:[#allocation9 + $0x23] ss:$0 sm:$0xff]  ;;  %v977_v62 = vld [vmem:[#allocation9 + $0x9] ss:$0 sm:$0xff] }
  0x3f   :  { %v343_v2 = vadd.f32 %v341_v26, %v306_v1 }
  0x40   :  { %v344_v11 = vadd.f32 %v342_v7, %v307_v6 }
  0x42   :  { %382 = vrot.lane.b32.xlu1 %v358_v44, %s1180_s4  ;;  %380 = vrot.lane.b32.xlu0 %v357_v45, %s1180_s4  ;;  %v1338_v44 = vmul.f32 %v975_v35, %v1327_v32  ;;  %v1341_v45 = vmul.f32 0.0, %v1322_v29 }
  0x43   :  { %376 = vrot.lane.b32.xlu2 %v351_v48, %s1179_s2  ;;  %v1000_v48 = vld [vmem:[#allocation9 + $0x1b] ss:$0 sm:$0xff] }
  0x95   :  { %v375_v23 = vpop.permute.xlu2 %374 }
  0x9d   :  { %v377_v17 = vpop.permute.xlu2 %376 }
  0xa4   :  { %v367_v14 = vpop.permute.xlu1 %366  ;;  %v361_v3 = vpop.permute.xlu0 %360 }
  0xa5   :  { %v364_v5 = vadd.f32 %v956_v61, %v361_v3 }
  0xa7   :  { %v370_v8 = vadd.f32 %v367_v14, %v364_v5 }
  0xa9   :  { %v372_v15 = vadd.f32 %v370_v8, %v343_v2 }
  0xab   :  { %v378_v12 = vadd.f32 %v375_v23, %v372_v15 }
  0xac   :  { %v369_v9 = vpop.permute.xlu1 %368  ;;  %v363_v10 = vpop.permute.xlu0 %362 }
  0xad   :  { %v365_v19 = vadd.f32 %v956_v61, %v363_v10 }
  0xaf   :  { %v371_v16 = vadd.f32 %v369_v9, %v365_v19  ;;  %v1402_v9 = vmul.f32 0.0, %v1346_v47 }
  0xb1   :  { %v373_v18 = vadd.f32 %v371_v16, %v344_v11  ;;  %1577 = vst [vmem:[#allocation25_spill] sm:$0xff] %v1402_v9 }
  0xb3   :  { %v379_v28 = vadd.f32 %v377_v17, %v373_v18 }
  0xb4   :  { %v383_v21 = vpop.permute.xlu1 %382  ;;  %v381_v22 = vpop.permute.xlu0 %380 }
  0xb5   :  { %v1313_v24 = vadd.f32 %v383_v21, %v379_v28  ;;  %v1315_v20 = vadd.f32 %v381_v22, %v378_v12 }
  0xb7   :  { %1570 = vst [vmem:[#allocation18_spill] sm:$0xff] %v1313_v24  ;;  %v539_v50 = vmul.f32 %v965_v38, %v1315_v20  ;;  %v532_v58 = vmul.f32 %v972_v31, %v1315_v20  ;;  %v533_v61 = vmul.f32 %v972_v31, %v1313_v24  ;;  %v547_v63 = vmul.f32 %v979_v36, %v1313_v24 }
  0xb8   :  { %1571 = vst [vmem:[#allocation19_spill] sm:$0xff] %v1315_v20  ;;  %v1369_v0 = vmul.f32 %v965_v38, %v1313_v24  ;;  %v1378_v13 = vmul.f32 %v979_v36, %v1315_v20  ;;  %v1381_v23 = vmul.f32 %v986_v40, %v1315_v20  ;;  %v1384_v5 = vmul.f32 %v993_v41, %v1315_v20 }
  0xb9   :  { %387 = vst [vmem:[#allocation3 + $0x11] sm:$0xff] %v1313_v24  ;;  %v1387_v26 = vmul.f32 %v993_v41, %v1313_v24  ;;  %v1396_v8 = vmul.f32 %v1000_v48, %v1313_v24  ;;  %v1399_v2 = vmul.f32 %v986_v40, %v1313_v24  ;;  %v1405_v10 = vmul.f32 %v1000_v48, %v1315_v20 }
  0xba   :  { %386 = vst [vmem:[#allocation3 + $0x9] sm:$0xff] %v1315_v20 }
  0xbb   :  { %1573 = vst [vmem:[#allocation21_spill] sm:$0xff] %v1384_v5 }
  0xbc   :  { %1574 = vst [vmem:[#allocation22_spill] sm:$0xff] %v1387_v26 }
  0xbd   :  { %1575 = vst [vmem:[#allocation23_spill] sm:$0xff] %v1396_v8 }
  0xbe   :  { %1576 = vst [vmem:[#allocation24_spill] sm:$0xff] %v1399_v2 }
  0xbf   :  { %1578 = vst [vmem:[#allocation26_spill] sm:$0xff] %v1405_v10 }
  0xc0   :  { %v1371_v14 = vld [vmem:[#allocation3 + $0x12] sm:$0xff] }
  0xc1   :  { %v1373_v3 = vld [vmem:[#allocation3 + $0x14] sm:$0xff]  ;;  %v1389_v1 = vld [vmem:[#allocation3 + $0x3] sm:$0xff]  ;;  %v1393_v7 = vld [vmem:[#allocation3 + $0xc] sm:$0xff]  ;;  %v692_v15 = vmul.f32 %v968_v34, %v1371_v14  ;;  %v685_v17 = vmul.f32 %v975_v35, %v1371_v14 }
  0xc2   :  { %v1375_v4 = vld [vmem:[#allocation3 + $0x17] sm:$0xff]  ;;  %v1391_v6 = vld [vmem:[#allocation3 + $0x6] sm:$0xff]  ;;  %v437_v19 = vmul.f32 %v1334_v42, %v1389_v1  ;;  %v1409_v11 = vld [vmem:[#allocation3 + $0xf] sm:$0xff]  ;;  %v430_v16 = vmul.f32 %v970_v51, %v1389_v1  ;;  %v584_v38 = vmul.f32 %v973_v59, %v1373_v3  ;;  %v590_v48 = vmul.f32 %v1361_v56, %v1393_v7 }
  0xc3   :  { %v1414_v18 = vld [vmem:[#allocation3 + $0x8] sm:$0xff]  ;;  %v488_v28 = vmul.f32 %v1348_v49, %v1391_v6  ;;  %v481_v21 = vmul.f32 %v971_v52, %v1391_v6  ;;  %v635_v31 = vmul.f32 %v974_v60, %v1375_v4  ;;  %v978_v34 = vld [vmem:[#allocation9 + $0x10] ss:$0 sm:$0xff]  ;;  %v641_v24 = vmul.f32 %v1363_v57, %v1409_v11 }
  0xc4   :  { %v1416_v12 = vld [vmem:[#allocation3 + $0xb] sm:$0xff]  ;;  %v439_v36 = vadd.f32 %v437_v19, %v398_v37  ;;  %v432_v40 = vadd.f32 %v430_v16, %v393_v43  ;;  %v394_v35 = vmul.f32 %v1319_v27, %v1414_v18  ;;  %v404_v20 = vmul.f32 %v1322_v29, %v1414_v18 }
  0xc5   :  { %v1421_v22 = vld [vmem:[#allocation3 + $0xe] sm:$0xff]  ;;  %v431_v41 = vmul.f32 %v970_v51, %v1416_v12  ;;  %v445_v10 = vmul.f32 %v977_v62, %v1416_v12  ;;  %v399_v16 = vmul.f32 %v1317_v25, %v1414_v18  ;;  %v438_v8 = vmul.f32 %v1334_v42, %v1416_v12 }
  0xc6   :  { %v490_v2 = vadd.f32 %v488_v28, %v439_v36  ;;  %v483_v9 = vadd.f32 %v481_v21, %v432_v40  ;;  %v482_v43 = vmul.f32 %v971_v52, %v1421_v22  ;;  %v496_v27 = vmul.f32 %v978_v34, %v1421_v22  ;;  %v980_v51 = vld [vmem:[#allocation9 + $0x1e] ss:$0 sm:$0xff]  ;;  %v981_v36 = vld [vmem:[#allocation9 + $0x25] ss:$0 sm:$0xff] }
  0xc7   :  { %v433_v37 = vadd.f32 %v431_v41, %v394_v35  ;;  %v447_v19 = vadd.f32 %v445_v10, %v404_v20  ;;  %v583_v29 = vmul.f32 %v973_v59, %v1393_v7  ;;  %v634_v28 = vmul.f32 %v974_v60, %v1409_v11  ;;  %v1448_v59 = vld [vmem:[#allocation9 + $0xc] ss:$0 sm:$0xff] }
  0xc8   :  { %v541_v26 = vadd.f32 %v539_v50, %v490_v2  ;;  %v534_v30 = vadd.f32 %v532_v58, %v483_v9  ;;  %v440_v52 = vadd.f32 %v438_v8, %v399_v16  ;;  %v489_v20 = vmul.f32 %v1348_v49, %v1421_v22 }
  0xc9   :  { %v484_v5 = vadd.f32 %v482_v43, %v433_v37  ;;  %v498_v21 = vadd.f32 %v496_v27, %v447_v19  ;;  %v444_v25 = vmul.f32 %v977_v62, %v1389_v1  ;;  %v598_v42 = vmul.f32 %v980_v51, %v1373_v3  ;;  %v1455_v62 = vld [vmem:[#allocation9 + $0x13] ss:$0 sm:$0xff]  ;;  %v1463_v19 = vld [vmem:[#allocation9 + $0x21] ss:$0 sm:$0xff]  ;;  %v992_v27 = vld [vmem:[#allocation9 + $0x12] ss:$0 sm:$0xff] }
  0xca   :  { %v592_v10 = vadd.f32 %v590_v48, %v541_v26  ;;  %v585_v40 = vadd.f32 %v583_v29, %v534_v30  ;;  %v491_v50 = vadd.f32 %v489_v20, %v440_v52  ;;  %v495_v58 = vmul.f32 %v978_v34, %v1391_v6  ;;  %v991_v48 = vld [vmem:[#allocation9 + $0xb] ss:$0 sm:$0xff]  ;;  %v1472_v29 = vld [vmem:[#allocation9 + $0x28] ss:$0 sm:$0xff]  ;;  %v994_v20 = vld [vmem:[#allocation9 + $0x20] ss:$0 sm:$0xff] }
  0xcb   :  { %v535_v35 = vadd.f32 %v533_v61, %v484_v5  ;;  %v549_v41 = vadd.f32 %v547_v63, %v498_v21  ;;  %v446_v8 = vadd.f32 %v444_v25, %v1341_v45  ;;  %v649_v49 = vmul.f32 %v981_v36, %v1375_v4  ;;  %v1457_v63 = vld [vmem:[#allocation9 + $0x3] ss:$0 sm:$0xff] }
  0xcc   :  { %v643_v60 = vadd.f32 %v641_v24, %v592_v10  ;;  %v636_v2 = vadd.f32 %v634_v28, %v585_v40  ;;  %v542_v30 = vadd.f32 %v1369_v0, %v491_v50  ;;  %v591_v61 = vmul.f32 %v1361_v56, %v1373_v3  ;;  %v996_v56 = vld [vmem:[#allocation9 + $0x2e] ss:$0 sm:$0xff]  ;;  %v1474_v28 = vld [vmem:[#allocation9 + $0x2f] ss:$0 sm:$0xff] }
  0xcd   :  { %v586_v9 = vadd.f32 %v584_v38, %v535_v35  ;;  %v600_v37 = vadd.f32 %v598_v42, %v549_v41  ;;  %v497_v24 = vadd.f32 %v495_v58, %v446_v8  ;;  %v642_v45 = vmul.f32 %v1363_v57, %v1375_v4  ;;  %v998_v41 = vld [vmem:[#allocation9 + $0xd] ss:$0 sm:$0xff]  ;;  %v999_v8 = vld [vmem:[#allocation9 + $0x14] ss:$0 sm:$0xff] }
  0xce   :  { %v694_v5 = vadd.f32 %v692_v15, %v643_v60  ;;  %v687_v26 = vadd.f32 %v685_v17, %v636_v2  ;;  %v593_v43 = vadd.f32 %v591_v61, %v542_v30  ;;  %v465_v0 = vmul.f32 %v1448_v59, %v1389_v1  ;;  %v995_v60 = vld [vmem:[#allocation9 + $0x27] ss:$0 sm:$0xff] }
  0xcf   :  { %v637_v34 = vadd.f32 %v635_v31, %v586_v9  ;;  %v651_v38 = vadd.f32 %v649_v49, %v600_v37  ;;  %v548_v17 = vadd.f32 %v1378_v13, %v497_v24  ;;  %v597_v31 = vmul.f32 %v980_v51, %v1393_v7 }
  0xd0   :  { %738 = vrot.lane.b32.xlu1 %v694_v5, %s1181_s21  ;;  %732 = vrot.lane.b32.xlu2 %v687_v26, %s1182_s22  ;;  %v467_v57 = vadd.f32 %v465_v0, %v1344_v46  ;;  %v516_v16 = vmul.f32 %v1455_v62, %v1391_v6  ;;  %v1477_v21 = vmul.f32 %v996_v56, %v1327_v32  ;;  %v1480_v52 = vmul.f32 0.0, %v1457_v63  ;;  %v1002_v0 = vld [vmem:[#allocation9 + $0x29] ss:$0 sm:$0xff] }
  0xd1   :  { %v688_v15 = vadd.f32 %v1338_v44, %v637_v34  ;;  %v644_v44 = vadd.f32 %v642_v45, %v593_v43  ;;  %v599_v13 = vadd.f32 %v597_v31, %v548_v17  ;;  %v648_v51 = vmul.f32 %v981_v36, %v1409_v11  ;;  %v1579_v34 = vld [vmem:[#allocation21_spill] sm:$0xff]  ;;  %v1580_v31 = vld [vmem:[#allocation20_spill] sm:$0xff] }
  0xd2   :  { %v458_v46 = vmul.f32 %v991_v48, %v1389_v1  ;;  %v702_v10 = vadd.f32 %v1353_v53, %v651_v38  ;;  %v699_v40 = vmul.f32 %v1332_v39, %v1371_v14  ;;  %v518_v35 = vadd.f32 %v516_v16, %v467_v57  ;;  %v1581_v16 = vld [vmem:[#allocation22_spill] sm:$0xff] }
  0xd3   :  { %734 = vrot.lane.b32.xlu0 %v688_v15, %s1182_s22  ;;  %v618_v25 = vmul.f32 %v1463_v19, %v1393_v7  ;;  %v650_v42 = vadd.f32 %v648_v51, %v599_v13  ;;  %v509_v58 = vmul.f32 %v992_v27, %v1391_v6  ;;  %v414_v36 = vmul.f32 %v1329_v33, %v1414_v18 }
  0xd4   :  { %v460_v50 = vadd.f32 %v458_v46, %v1359_v55  ;;  %v569_v2 = vadd.f32 %v1381_v23, %v518_v35  ;;  %v669_v53 = vmul.f32 %v1472_v29, %v1409_v11  ;;  %v720_v39 = vmul.f32 %v1474_v28, %v1371_v14 }
  0xd5   :  { %v459_v9 = vmul.f32 %v991_v48, %v1416_v12  ;;  %v695_v37 = vadd.f32 %v1356_v54, %v644_v44  ;;  %v611_v49 = vmul.f32 %v994_v20, %v1393_v7  ;;  %v424_v30 = vmul.f32 %v1346_v47, %v1414_v18  ;;  %v1001_v48 = vld [vmem:[#allocation9 + $0x22] ss:$0 sm:$0xff] }
  0xd6   :  { %v511_v55 = vadd.f32 %v509_v58, %v460_v50  ;;  %v620_v33 = vadd.f32 %v618_v25, %v569_v2  ;;  %v510_v23 = vmul.f32 %v992_v27, %v1421_v22  ;;  %v473_v5 = vmul.f32 %v998_v41, %v1416_v12  ;;  %v1582_v58 = vld [vmem:[#allocation23_spill] sm:$0xff] }
  0xd7   :  { %v461_v61 = vadd.f32 %v459_v9, %v414_v36  ;;  %v701_v26 = vadd.f32 %v699_v40, %v650_v42  ;;  %v662_v54 = vmul.f32 %v995_v60, %v1409_v11  ;;  %v713_v38 = vmul.f32 %v996_v56, %v1371_v14  ;;  %v1003_v40 = vld [vmem:[#allocation9 + $0x30] ss:$0 sm:$0xff]  ;;  %v1006_v42 = vld [vmem:[#allocation9 + $0xa] ss:$0 sm:$0xff] }
  0xd8   :  { %746 = vrot.lane.b32.xlu1 %v702_v10, %s1183_s23  ;;  %740 = vrot.lane.b32.xlu2 %v695_v37, %s1181_s21  ;;  %v562_v24 = vadd.f32 %v1579_v34, %v511_v55  ;;  %v475_v47 = vadd.f32 %v473_v5, %v424_v30  ;;  %v524_v45 = vmul.f32 %v999_v8, %v1421_v22  ;;  %v1007_v37 = vld [vmem:[#allocation9 + $0x11] ss:$0 sm:$0xff]  ;;  %v1583_v30 = vld [vmem:[#allocation25_spill] sm:$0xff]  ;;  %v1008_v5 = vld [vmem:[#allocation9 + $0x18] ss:$0 sm:$0xff] }
  0xd9   :  { %v512_v43 = vadd.f32 %v510_v23, %v461_v61  ;;  %v671_v15 = vadd.f32 %v669_v53, %v620_v33  ;;  %v419_v27 = vmul.f32 %v1580_v31, %v1414_v18  ;;  %v466_v57 = vmul.f32 %v1448_v59, %v1416_v12  ;;  %v1584_v61 = vld [vmem:[#allocation24_spill] sm:$0xff]  ;;  %v1586_v31 = vld [vmem:[#allocation19_spill] sm:$0xff] }
  0xda   :  { %v613_v17 = vadd.f32 %v611_v49, %v562_v24  ;;  %v612_v13 = vmul.f32 %v994_v20, %v1373_v3  ;;  %v663_v56 = vmul.f32 %v995_v60, %v1375_v4  ;;  %v526_v51 = vadd.f32 %v524_v45, %v475_v47  ;;  %v1009_v45 = vld [vmem:[#allocation9 + $0x1f] ss:$0 sm:$0xff] }
  0xdb   :  { %744 = vrot.lane.b32.xlu0 %v701_v26, %s1183_s23  ;;  %v563_v44 = vadd.f32 %v1581_v16, %v512_v43  ;;  %v626_v10 = vmul.f32 %v1001_v48, %v1373_v3  ;;  %v468_v35 = vadd.f32 %v466_v57, %v419_v27  ;;  %v517_v25 = vmul.f32 %v1455_v62, %v1421_v22  ;;  %v1010_v57 = vld [vmem:[#allocation9 + $0x26] ss:$0 sm:$0xff] }
  0xdc   :  { %v664_v46 = vadd.f32 %v662_v54, %v613_v17  ;;  %v577_v36 = vadd.f32 %v1582_v58, %v526_v51  ;;  %v677_v59 = vmul.f32 %v1002_v0, %v1375_v4  ;;  %v472_v2 = vmul.f32 %v998_v41, %v1389_v1 }
  0xdd   :  { %v614_v50 = vadd.f32 %v612_v13, %v563_v44  ;;  %v722_v20 = vadd.f32 %v720_v39, %v671_v15  ;;  %v728_v60 = vmul.f32 %v1003_v40, %v1327_v32  ;;  %v519_v9 = vadd.f32 %v517_v25, %v468_v35 }
  0xde   :  { %v715_v53 = vadd.f32 %v713_v38, %v664_v46  ;;  %v628_v49 = vadd.f32 %v626_v10, %v577_v36  ;;  %v474_v33 = vadd.f32 %v472_v2, %v1583_v30  ;;  %v523_v62 = vmul.f32 %v999_v8, %v1391_v6  ;;  %v1011_v46 = vld [vmem:[#allocation9 + $0x2d] ss:$0 sm:$0xff] }
  0xdf   :  { %v665_v55 = vadd.f32 %v663_v56, %v614_v50  ;;  %v570_v23 = vadd.f32 %v1584_v61, %v519_v9  ;;  %v619_v41 = vmul.f32 %v1463_v19, %v1373_v3  ;;  %v451_v39 = vmul.f32 %v1006_v42, %v1389_v1  ;;  %v1585_v19 = vld [vmem:[#allocation26_spill] sm:$0xff] }
  0xe0   :  { %758 = vrot.lane.b32.xlu1 %v722_v20, %s1184_s24  ;;  %752 = vrot.lane.b32.xlu2 %v715_v53, %s1185_s25  ;;  %v670_v34 = vmul.f32 %v1472_v29, %v1375_v4  ;;  %v721_v8 = vmul.f32 %v1474_v28, %v1327_v32  ;;  %v525_v24 = vadd.f32 %v523_v62, %v474_v33  ;;  %v1587_v10 = vld [vmem:[#allocation18_spill] sm:$0xff]  ;;  %v1004_v62 = vld [vmem:[#allocation12 + $0x1] ss:$0 sm:$0xff] }
  0xe1   :  { %v716_v26 = vadd.f32 %v1477_v21, %v665_v55  ;;  %v679_v54 = vadd.f32 %v677_v59, %v628_v49  ;;  %v621_v38 = vadd.f32 %v619_v41, %v570_v23  ;;  %v453_v43 = vadd.f32 %v451_v39, %v1480_v52  ;;  %v913_v9 = vld [vmem:[#allocation10 + $0x30] sm:$0xff]  ;;  %v908_v55 = vld [vmem:[#allocation10 + $0x8] sm:$0xff] }
  0xe2   :  { %v502_v47 = vmul.f32 %v1007_v37, %v1391_v6  ;;  %v576_v1 = vadd.f32 %v1585_v19, %v525_v24  ;;  %v625_v15 = vmul.f32 %v1001_v48, %v1393_v7  ;;  %v409_v21 = vmul.f32 %v1457_v63, %v1414_v18 }
  0xe3   :  { %754 = vrot.lane.b32.xlu0 %v716_v26, %s1185_s25  ;;  %v452_v29 = vmul.f32 %v1006_v42, %v1416_v12  ;;  %v672_v17 = vadd.f32 %v670_v34, %v621_v38  ;;  %v553_v27 = vmul.f32 %v1008_v5, %v1586_v31  ;;  %v676_v52 = vmul.f32 %v1002_v0, %v1409_v11 }
  0xe4   :  { %v504_v28 = vadd.f32 %v502_v47, %v453_v43  ;;  %v627_v16 = vadd.f32 %v625_v15, %v576_v1  ;;  %v503_v44 = vmul.f32 %v1007_v37, %v1421_v22  ;;  %v730_v13 = vadd.f32 %v728_v60, %v679_v54  ;;  %v914_v60 = vld [vmem:[#allocation10 + $0x38] sm:$0xff]  ;;  %v911_v37 = vld [vmem:[#allocation10 + $0x20] sm:$0xff] }
  0xe5   :  { %v454_v6 = vadd.f32 %v452_v29, %v409_v21  ;;  %v723_v56 = vadd.f32 %v721_v8, %v672_v17  ;;  %v604_v48 = vmul.f32 %v1009_v45, %v1393_v7  ;;  %v727_v12 = vmul.f32 %v1003_v40, %v1371_v14  ;;  %836 = vmatpush.bf16.msra.mxu0 %v914_v60 }
  0xe6   :  { %v555_v51 = vadd.f32 %v553_v27, %v504_v28  ;;  %v678_v18 = vadd.f32 %v676_v52, %v627_v16  ;;  %v554_v35 = vmul.f32 %v1008_v5, %v1587_v10  ;;  %v655_v25 = vmul.f32 %v1010_v57, %v1409_v11  ;;  %v912_v11 = vld [vmem:[#allocation10 + $0x28] sm:$0xff] }
  0xe7   :  { %v505_v63 = vadd.f32 %v503_v44, %v454_v6  ;;  %v605_v50 = vmul.f32 %v1009_v45, %v1373_v3  ;;  %v706_v7 = vmul.f32 %v1011_v46, %v1371_v14  ;;  %v656_v40 = vmul.f32 %v1010_v57, %v1375_v4  ;;  %v910_v3 = vld [vmem:[#allocation10 + $0x18] sm:$0xff]  ;;  %v909_v14 = vld [vmem:[#allocation10 + $0x10] sm:$0xff]  ;;  %v907_v4 = vld [vmem:[#allocation10] sm:$0xff] }
  0xe8   :  { %766 = vrot.lane.b32.xlu1 %v730_v13, %s1186_s26  ;;  %760 = vrot.lane.b32.xlu2 %v723_v56, %s1184_s24  ;;  %v606_v0 = vadd.f32 %v604_v48, %v555_v51  ;;  %v729_v22 = vadd.f32 %v727_v12, %v678_v18  ;;  %v707_v59 = vmul.f32 %v1011_v46, %v1327_v32  ;;  %v1012_v57 = vld [vmem:[#allocation12 + $0x2] ss:$0 sm:$0xff]  ;;  %v1013_v6 = vld [vmem:[#allocation2 + $0x2] sm:$0xff]  ;;  %v1014_v51 = vld [vmem:[#allocation2 + $0xa] sm:$0xff] }
  0xe9   :  { %v556_v42 = vadd.f32 %v554_v35, %v505_v63  ;;  %837 = vmatpush.bf16.msra.mxu0 %v913_v9 }
  0xea   :  { %v657_v58 = vadd.f32 %v655_v25, %v606_v0 }
  0xeb   :  { %764 = vrot.lane.b32.xlu0 %v729_v22, %s1186_s26  ;;  %v607_v36 = vadd.f32 %v605_v50, %v556_v42 }
  0xec   :  { %v708_v2 = vadd.f32 %v706_v7, %v657_v58 }
  0xed   :  { %v658_v20 = vadd.f32 %v656_v40, %v607_v36  ;;  %838 = vmatpush.bf16.msra.mxu0 %v912_v11 }
  0xef   :  { %v709_v53 = vadd.f32 %v707_v59, %v658_v20 }
  0xf1   :  { %839 = vmatpush.bf16.msra.mxu0 %v911_v37 }
  0xf5   :  { %840 = vmatpush.bf16.msra.mxu0 %v910_v3 }
  0xf9   :  { %841 = vmatpush.bf16.msra.mxu0 %v909_v14 }
  0xfd   :  { %842 = vmatpush.bf16.msra.mxu0 %v908_v55 }
 0x101   :  { %843 = vmatpush.bf16.msra.mxu0 %v907_v4 }
 0x12a   :  { %v733_v49 = vpop.permute.xlu2 %732 }
 0x12b   :  { %v736_v39 = vadd.f32 %v1004_v62, %v733_v49 }
 0x132   :  { %v741_v33 = vpop.permute.xlu2 %740 }
 0x13a   :  { %v753_v26 = vpop.permute.xlu2 %752 }
 0x142   :  { %v739_v32 = vpop.permute.xlu1 %738  ;;  %v761_v19 = vpop.permute.xlu2 %760 }
 0x143   :  { %v742_v34 = vadd.f32 %v739_v32, %v736_v39 }
 0x145   :  { %v735_v30 = vpop.permute.xlu0 %734 }
 0x146   :  { %v737_v61 = vadd.f32 %v1004_v62, %v735_v30 }
 0x148   :  { %v743_v5 = vadd.f32 %v741_v33, %v737_v61 }
 0x14a   :  { %v747_v23 = vpop.permute.xlu1 %746 }
 0x14b   :  { %v749_v8 = vadd.f32 %v747_v23, %v743_v5 }
 0x14d   :  { %v745_v41 = vpop.permute.xlu0 %744  ;;  %v751_v38 = vadd.f32 %v749_v8, %v709_v53 }
 0x14e   :  { %v748_v24 = vadd.f32 %v745_v41, %v742_v34 }
 0x150   :  { %v750_v47 = vadd.f32 %v748_v24, %v708_v2 }
 0x152   :  { %v759_v54 = vpop.permute.xlu1 %758  ;;  %v756_v1 = vadd.f32 %v753_v26, %v750_v47 }
 0x154   :  { %v762_v29 = vadd.f32 %v759_v54, %v756_v1 }
 0x155   :  { %v755_v43 = vpop.permute.xlu0 %754 }
 0x156   :  { %v757_v45 = vadd.f32 %v755_v43, %v751_v38 }
 0x158   :  { %v763_v21 = vadd.f32 %v761_v19, %v757_v45 }
 0x15a   :  { %v767_v15 = vpop.permute.xlu1 %766 }
 0x15b   :  { %v769_v17 = vadd.f32 %v767_v15, %v763_v21 }
 0x15d   :  { %v765_v28 = vpop.permute.xlu0 %764 }
 0x15e   :  { %v768_v31 = vadd.f32 %v765_v28, %v762_v29 }
 0x160   :  { %v770_v27 = vpack.c.bf16 %v769_v17, %v768_v31 }
 0x162   :  { %844 = vmatmul.bf16.vlgmr.msra.gmra.mxu0 %v770_v27 }
 0x1df   :  { %v845_v16 = vpop.f32.mrf.mxu0 }
 0x1e0   :  { %v846_v52 = vadd.f32 %v1012_v57, %v845_v16 }
 0x1e2   :  { %v850_v44 = vmul.f32 %v1013_v6, %v846_v52 }
 0x1e4   :  { %852 = vst [vmem:[#allocation13] sm:$0xff] %v850_v44 }
 0x1e7   :  { %v847_v13 = vpop.f32.mrf.mxu0 }
 0x1e8   :  { %v848_v56 = vadd.f32 %v1012_v57, %v847_v13 }
 0x1ea   :  { %v851_v48 = vmul.f32 %v1014_v51, %v848_v56 }
 0x1ec   :  { %853 = vst [vmem:[#allocation13 + $0x8] sm:$0xff] %v851_v48 }
 0x1ed   :  { %866 = dma.vmem_to_hbm [thread:$0]  %s859_s28, 256, %s861_s6, [#allocation6], %s1174_s13, %s1174_s13, %s1175_s14  }
 0x1ee   :  { %1165 = dma.done.wait [#allocation6], 256  }
 0x1ef   :  { %1166 = vsyncadd [#allocation6], 4294967040 }
 0x1f0   :  { %871 = vsyncpa [#allocation5], 1 }
 0x1f1   :  { %872 = vsyncpa [#allocation8], 1 }
 0x1f2   :  { %873 = vsyncpa [#allocation11], 1 }
 0x1f3   :  { %874 = vsyncpa [#allocation6], 1 }

</bundles_post_ra>
